<compile_context>
chip_gen: v6e
topology: v6e:2x2x1
jax: 0.10.0
libtpu: 0.0.40
codegen_flags: <defaults>
</compile_context>

<pallas_src>
import jax
import jax.numpy as jnp
from jax import lax
from jax.experimental import pallas as pl
from jax.experimental.pallas import tpu as pltpu

# ----------------------------- config (small) ------------------------------
N_VOCAB = 50
EMB_DIM = 64
HIDDEN = 32          # hidden_size
N_CLASSES = 3
HEAD_PAD = 128       # padded width of the MLP hidden layer (lane-dense)
N_CLASSES_PAD = 128  # lane-dense logits slab inside the kernel
PADDING_IDX = 0

# fused gate layout: (i, f, o, g), each gate interleaved [fwd | bwd]
GATE_PERM = (0, 1, 3, 2)   # permutation from PyTorch's (i, f, g, o)


# -------------------- Pallas kernel: fused InferSent forward ----------------
def infersent_kernel(x_ref, lens_ref, wih_ref, whh_ref, b_ref,
                     w1_ref, b1_ref, w2_ref, b2_ref, out_ref, xg_scr):
    # x_ref   : [S*2B, E] bf16   row (t*2B + n) = x_n[t], time-major
    # lens_ref: [2B, 1]   int32  valid lengths (q1 rows then q2 rows)
    # wih_ref : [E, 8H]   bf16   dense input->gate weights (fwd cols | bwd cols)
    # whh_ref : [2H, 8H]  bf16   block-structured recurrent weights
    # b_ref   : [1, 8H]   f32    b_ih + b_hh, fused gate layout
    # w1_ref  : [8H, 128] bf16   MLP hidden (padded to 128 cols)
    # w2_ref  : [128,128] bf16   MLP out (padded)
    # out_ref : [2B, 128] f32    lane/sublane-dense logits slab (rows B:2B junk)
    # xg_scr  : [S*2B, 8H] bf16  precomputed input gate contributions
    B2 = lens_ref.shape[0]
    S = x_ref.shape[0] // B2
    H2 = whh_ref.shape[0]          # 2 * hidden
    H = H2 // 2
    G = 4 * H2                     # 8H fused gate width

    # ---- (1) hoisted input projection: one dense matmul, stored bf16 -------
    xg_scr[...] = jnp.dot(x_ref[...], wih_ref[...],
                          preferred_element_type=jnp.float32
                          ).astype(jnp.bfloat16)               # [S*2B, 8H]

    lens = lens_ref[...]                                       # [2B, 1] int32
    whh = whh_ref[...]                                         # [2H, 8H] bf16
    bias = jnp.broadcast_to(b_ref[...], (B2, G))               # hoisted broadcast

    # fwd-direction column masks (first H lanes of every 2H slab are forward)
    dircol = lax.broadcasted_iota(jnp.int32, (1, H2), 1) < H   # state cols
    gfwd = (lax.broadcasted_iota(jnp.int32, (1, G), 1) % H2) < H  # gate cols

    h = jnp.zeros((B2, H2), jnp.bfloat16)   # bf16 recurrent state (MXU operand)
    c = jnp.zeros((B2, H2), jnp.float32)
    acc = jnp.full((B2, H2), -1e9, jnp.float32)                # running max pool

    # ---- (2) fused fwd/bwd recurrence, fully unrolled, state in vregs ------
    for t in range(S):
        # fwd half uses x[t], bwd half uses x[S-1-t]: one VPU select
        gx_f = xg_scr[pl.ds(t * B2, B2), :]                    # [2B, 8H] bf16
        gx_b = xg_scr[pl.ds((S - 1 - t) * B2, B2), :]
        gx = jnp.where(gfwd, gx_f, gx_b).astype(jnp.float32)

        gates = gx + bias + jnp.dot(h, whh,
                                    preferred_element_type=jnp.float32)
        # fused nonlinearities: one sigmoid over [i|f|o] (192 lanes), one tanh
        sg = jax.nn.sigmoid(gates[:, :3 * H2])
        i_g = sg[:, 0 * H2:1 * H2]
        f_g = sg[:, 1 * H2:2 * H2]
        o_g = sg[:, 2 * H2:3 * H2]
        g_g = jnp.tanh(gates[:, 3 * H2:4 * H2])
        c_new = f_g * c + i_g * g_g
        h_new = o_g * jnp.tanh(c_new)

        # fwd half processes real time t, bwd half processes real time S-1-t
        tcol = jnp.where(dircol, jnp.int32(t), jnp.int32(S - 1 - t))
        valid = lens > tcol                                    # [2B, 2H] bool
        h = jnp.where(valid, h_new.astype(jnp.bfloat16), h)    # freeze past end
        c = jnp.where(valid, c_new, c)
        acc = jnp.where(valid, jnp.maximum(acc, h_new), acc)   # masked running max

    # ---- (3) merge + MLP head fused in the same kernel ----------------------
    acc = jnp.where(lens > 0, acc, 0.0)       # length-0 rows: pooled vec = 0
    B = B2 // 2
    # swap the two sentence halves so merge is built over all 2B rows; only
    # rows 0:B are real (rows B:2B hold the (v,u) pairing and are discarded),
    # keeping the head matmuls / final store full-sublane and unmasked.
    acc_sw = jnp.concatenate([acc[B:], acc[:B]], axis=0)               # [2B, 2H]
    merge = jnp.concatenate(
        [acc, acc_sw, jnp.abs(acc - acc_sw), acc * acc_sw], axis=-1)   # [2B, 8H]
    hid = jnp.tanh(jnp.dot(merge.astype(w1_ref.dtype), w1_ref[...],
                           preferred_element_type=jnp.float32) + b1_ref[...])
    logits = jnp.dot(hid.astype(w2_ref.dtype), w2_ref[...],
                     preferred_element_type=jnp.float32) + b2_ref[...]
    out_ref[...] = logits                                      # [2B, 128] dense


def infersent_pallas(x2d, lens, kp):
    B2 = lens.shape[0]
    S = x2d.shape[0] // B2
    H = kp["whh"].shape[0] // 2
    vmem = pl.BlockSpec(memory_space=pltpu.MemorySpace.VMEM)
    return pl.pallas_call(
        infersent_kernel,
        out_shape=jax.ShapeDtypeStruct((B2, N_CLASSES_PAD), jnp.float32),
        in_specs=[vmem] * 9,
        out_specs=vmem,
        scratch_shapes=[pltpu.VMEM((S * B2, 8 * H), jnp.bfloat16)],  # bf16 gates
    )(x2d, lens, kp["wih"], kp["whh"], kp["b"],
      kp["w1"], kp["b1"], kp["w2"], kp["b2"])


# ------------------------------ parameter init ------------------------------
def xavier_uniform(key, shape):
    fan_in, fan_out = shape
    limit = (6.0 / (fan_in + fan_out)) ** 0.5
    return jax.random.uniform(key, shape, jnp.float32, -limit, limit)


def init_params(key):
    ks = jax.random.split(key, 8)
    H, E = HIDDEN, EMB_DIM
    word_emb = 0.1 * jax.random.normal(ks[0], (N_VOCAB, E), jnp.float32)
    word_emb = word_emb.at[PADDING_IDX].set(0.0)   # padding_idx row is zero
    return dict(
        word_emb=word_emb,
        # LSTM weights stored transposed vs PyTorch: W_ih -> [E, 4H], W_hh -> [H, 4H],
        # gate order (i, f, g, o).  b_* = b_ih + b_hh (sum the two when porting real
        # PyTorch weights; both are zero-initialized here).
        wih_f=xavier_uniform(ks[1], (E, 4 * H)),
        whh_f=xavier_uniform(ks[2], (H, 4 * H)),
        b_f=jnp.zeros((1, 4 * H), jnp.float32),
        wih_b=xavier_uniform(ks[3], (E, 4 * H)),
        whh_b=xavier_uniform(ks[4], (H, 4 * H)),
        b_b=jnp.zeros((1, 4 * H), jnp.float32),
        w1=xavier_uniform(ks[5], (8 * H, H)),
        b1=jnp.zeros((1, H), jnp.float32),
        w2=xavier_uniform(ks[6], (H, N_CLASSES)),
        b2=jnp.zeros((1, N_CLASSES), jnp.float32),
    )


def _pack_gates(wf, wb, H):
    # [*, 4H] (i,f,g,o) per direction -> [*, 8H] laid out
    # [i_f, i_b, f_f, f_b, o_f, o_b, g_f, g_b]   (sigmoid gates contiguous)
    parts = []
    for k in GATE_PERM:
        parts.append(wf[:, k * H:(k + 1) * H])
        parts.append(wb[:, k * H:(k + 1) * H])
    return jnp.concatenate(parts, axis=-1)


def pack_kernel_params(p):
    """Build the fused / bf16 weights the kernel consumes (done once)."""
    H = HIDDEN
    zH = jnp.zeros((H, 4 * H), jnp.float32)
    # dense input projection: fwd weights in fwd gate cols, bwd in bwd gate cols
    wih = _pack_gates(p["wih_f"], p["wih_b"], H)                            # [E, 8H]
    # rows 0:H are h_f -> fwd gate columns, rows H:2H are h_b -> bwd gate columns
    whh = _pack_gates(jnp.concatenate([p["whh_f"], zH], axis=0),
                      jnp.concatenate([zH, p["whh_b"]], axis=0), H)         # [2H, 8H]
    b = _pack_gates(p["b_f"], p["b_b"], H)                                  # [1, 8H]
    # lane/sublane-padded MLP head
    w1 = jnp.zeros((8 * H, HEAD_PAD), jnp.float32).at[:, :H].set(p["w1"])
    b1 = jnp.zeros((1, HEAD_PAD), jnp.float32).at[:, :H].set(p["b1"])
    w2 = jnp.zeros((HEAD_PAD, N_CLASSES_PAD),
                   jnp.float32).at[:H, :N_CLASSES].set(p["w2"])
    b2 = jnp.zeros((1, N_CLASSES_PAD), jnp.float32).at[:, :N_CLASSES].set(p["b2"])
    return dict(
        wih=wih.astype(jnp.bfloat16),
        whh=whh.astype(jnp.bfloat16),
        b=b,                                   # f32 (added in-kernel post-matmul)
        w1=w1.astype(jnp.bfloat16),
        b1=b1,
        w2=w2.astype(jnp.bfloat16),
        b2=b2,
    )


# ------------------------------ full forward --------------------------------
def infersent_forward(params, kp, q1, q1_len, q2, q2_len):
    emb = params["word_emb"]
    B, S1 = q1.shape
    _, S2 = q2.shape
    S = max(S1, S2)
    e1 = jnp.take(emb, q1, axis=0)                       # [B, S1, E]
    e2 = jnp.take(emb, q2, axis=0)                       # [B, S2, E]
    e1 = jnp.pad(e1, ((0, 0), (0, S - S1), (0, 0)))      # pad both to common S
    e2 = jnp.pad(e2, ((0, 0), (0, S - S2), (0, 0)))
    x = jnp.concatenate([e1, e2], axis=0)                # [2B, S, E] (q1 rows, q2 rows)
    lens = jnp.concatenate([q1_len, q2_len]).astype(jnp.int32).reshape(2 * B, 1)
    x_sbe = jnp.transpose(x, (1, 0, 2))                  # [S, 2B, E] time-major
    x2d = x_sbe.reshape(S * 2 * B, EMB_DIM).astype(jnp.bfloat16)
    logits_pad = infersent_pallas(x2d, lens, kp)         # [2B, 128]
    return logits_pad[:B, :N_CLASSES]


# ---------------------------------- main -------------------------------------
if __name__ == "__main__":
    key = jax.random.PRNGKey(0)
    pkey, tkey1, tkey2 = jax.random.split(key, 3)
    params = init_params(pkey)
    kp = pack_kernel_params(params)

    B, S1, S2 = 4, 10, 12
    q1_len = jnp.array([10, 7, 4, 1], jnp.int32)
    q2_len = jnp.array([12, 9, 5, 2], jnp.int32)
    q1_tok = jax.random.randint(tkey1, (B, S1), 1, N_VOCAB)
    q2_tok = jax.random.randint(tkey2, (B, S2), 1, N_VOCAB)
    # zero-pad beyond each sequence's length (token 0 == padding_idx)
    q1 = jnp.where(jnp.arange(S1)[None, :] < q1_len[:, None], q1_tok, 0)
    q2 = jnp.where(jnp.arange(S2)[None, :] < q2_len[:, None], q2_tok, 0)

    logits = infersent_forward(params, kp, q1, q1_len, q2, q2_len)
    jax.block_until_ready(logits)
    assert logits.shape == (B, N_CLASSES)
    print("KERNEL_OK")
</pallas_src>

<mosaic_0001>
module attributes {stable_mosaic.version = 11 : i64} {
  func.func @infersent_kernel(%arg0: memref<96x64xbf16, #tpu.memory_space<vmem>>, %arg1: memref<8x1xi32, #tpu.memory_space<vmem>>, %arg2: memref<64x256xbf16, #tpu.memory_space<vmem>>, %arg3: memref<64x256xbf16, #tpu.memory_space<vmem>>, %arg4: memref<1x256xf32, #tpu.memory_space<vmem>>, %arg5: memref<256x128xbf16, #tpu.memory_space<vmem>>, %arg6: memref<1x128xf32, #tpu.memory_space<vmem>>, %arg7: memref<128x128xbf16, #tpu.memory_space<vmem>>, %arg8: memref<1x128xf32, #tpu.memory_space<vmem>>, %arg9: memref<8x128xf32, #tpu.memory_space<vmem>>, %arg10: memref<96x256xbf16, #tpu.memory_space<vmem>>) attributes {dimension_semantics = [], scalar_prefetch = 0 : i64, scratch_operands = 1 : i64, tpu.core_type = #tpu.core_type<tc>} {
    %c0 = arith.constant 0 : index
    %c0_0 = arith.constant 0 : index
    %0 = vector.load %arg0[%c0, %c0_0] : memref<96x64xbf16, #tpu.memory_space<vmem>>, vector<96x64xbf16>
    %c0_1 = arith.constant 0 : index
    %c0_2 = arith.constant 0 : index
    %1 = vector.load %arg2[%c0_1, %c0_2] : memref<64x256xbf16, #tpu.memory_space<vmem>>, vector<64x256xbf16>
    %cst = arith.constant dense<0.000000e+00> : vector<96x256xf32>
    %2 = tpu.matmul %0, %1, %cst {dimension_numbers = #tpu.dot_dimension_numbers<[1], [0], [0], [1], [0, 0, 1, 1], [], []>} : vector<96x64xbf16>, vector<64x256xbf16>, vector<96x256xf32> -> vector<96x256xf32>
    %3 = arith.truncf %2 : vector<96x256xf32> to vector<96x256xbf16>
    %c0_3 = arith.constant 0 : index
    %c0_4 = arith.constant 0 : index
    %4 = vector.load %arg10[%c0_3, %c0_4] : memref<96x256xbf16, #tpu.memory_space<vmem>>, vector<96x256xbf16>
    tpu.vector_store %arg10[%c0_3, %c0_4], %3 {strides = array<i32>} : memref<96x256xbf16, #tpu.memory_space<vmem>>, vector<96x256xbf16>,
    %c0_5 = arith.constant 0 : index
    %c0_6 = arith.constant 0 : index
    %5 = vector.load %arg1[%c0_5, %c0_6] : memref<8x1xi32, #tpu.memory_space<vmem>>, vector<8x1xi32>
    %c0_7 = arith.constant 0 : index
    %c0_8 = arith.constant 0 : index
    %6 = vector.load %arg3[%c0_7, %c0_8] : memref<64x256xbf16, #tpu.memory_space<vmem>>, vector<64x256xbf16>
    %c0_9 = arith.constant 0 : index
    %c0_10 = arith.constant 0 : index
    %7 = vector.load %arg4[%c0_9, %c0_10] : memref<1x256xf32, #tpu.memory_space<vmem>>, vector<1x256xf32>
    %8 = vector.shape_cast %7 : vector<1x256xf32> to vector<1x256xf32>
    %9 = vector.broadcast %8 : vector<1x256xf32> to vector<8x256xf32>
    %10 = tpu.iota {dimensions = array<i32: 1>} : vector<1x64xi32>
    %c32_i32 = arith.constant 32 : i32
    %11 = vector.broadcast %c32_i32 : i32 to vector<1x64xi32>
    %12 = arith.cmpi slt, %10, %11 : vector<1x64xi32>
    %13 = tpu.iota {dimensions = array<i32: 1>} : vector<1x256xi32>
    %c64_i32 = arith.constant 64 : i32
    %c0_i32 = arith.constant 0 : i32
    %14 = arith.cmpi eq, %c64_i32, %c0_i32 : i32
    %c1_i32 = arith.constant 1 : i32
    %15 = arith.select %14, %c1_i32, %c64_i32 : i32
    %16 = vector.broadcast %15 : i32 to vector<1x256xi32>
    %17 = arith.remsi %13, %16 : vector<1x256xi32>
    %c0_i32_11 = arith.constant 0 : i32
    %18 = vector.broadcast %c0_i32_11 : i32 to vector<1x256xi32>
    %19 = arith.cmpi ne, %17, %18 : vector<1x256xi32>
    %c0_i32_12 = arith.constant 0 : i32
    %20 = vector.broadcast %c0_i32_12 : i32 to vector<1x256xi32>
    %21 = arith.cmpi slt, %17, %20 : vector<1x256xi32>
    %c0_i32_13 = arith.constant 0 : i32
    %22 = arith.cmpi slt, %15, %c0_i32_13 : i32
    %23 = vector.broadcast %22 : i1 to vector<1x256xi1>
    %24 = vector.broadcast %23 : vector<1x256xi1> to vector<1x256xi1>
    %25 = arith.xori %21, %24 : vector<1x256xi1>
    %26 = arith.andi %25, %19 : vector<1x256xi1>
    %27 = vector.broadcast %15 : i32 to vector<1x256xi32>
    %28 = arith.addi %17, %27 : vector<1x256xi32>
    %29 = arith.select %26, %28, %17 : vector<1x256xi1>, vector<1x256xi32>
    %c32_i32_14 = arith.constant 32 : i32
    %30 = vector.broadcast %c32_i32_14 : i32 to vector<1x256xi32>
    %31 = arith.cmpi slt, %29, %30 : vector<1x256xi32>
    %cst_15 = arith.constant 0.000000e+00 : bf16
    %32 = vector.broadcast %cst_15 : bf16 to vector<8x64xbf16>
    %cst_16 = arith.constant 0.000000e+00 : f32
    %33 = vector.broadcast %cst_16 : f32 to vector<8x64xf32>
    %cst_17 = arith.constant -1.000000e+09 : f32
    %34 = vector.broadcast %cst_17 : f32 to vector<8x64xf32>
    %c0_18 = arith.constant 0 : index
    %c0_19 = arith.constant 0 : index
    %35 = vector.load %arg10[%c0_18, %c0_19] : memref<96x256xbf16, #tpu.memory_space<vmem>>, vector<8x256xbf16>
    %c88 = arith.constant 88 : index
    %c0_20 = arith.constant 0 : index
    %36 = vector.load %arg10[%c88, %c0_20] : memref<96x256xbf16, #tpu.memory_space<vmem>>, vector<8x256xbf16>
    %37 = vector.shape_cast %31 : vector<1x256xi1> to vector<1x256xi1>
    %38 = vector.broadcast %37 : vector<1x256xi1> to vector<8x256xi1>
    %39 = arith.select %38, %35, %36 : vector<8x256xi1>, vector<8x256xbf16>
    %40 = arith.extf %39 : vector<8x256xbf16> to vector<8x256xf32>
    %41 = arith.addf %40, %9 : vector<8x256xf32>
    %cst_21 = arith.constant dense<0.000000e+00> : vector<8x256xf32>
    %42 = tpu.matmul %32, %6, %cst_21 {dimension_numbers = #tpu.dot_dimension_numbers<[1], [0], [0], [1], [0, 0, 1, 1], [], []>} : vector<8x64xbf16>, vector<64x256xbf16>, vector<8x256xf32> -> vector<8x256xf32>
    %43 = arith.addf %41, %42 : vector<8x256xf32>
    %44 = vector.extract_strided_slice %43 {offsets = [0, 0], sizes = [8, 192], strides = [1, 1]} : vector<8x256xf32> to vector<8x192xf32>
    %45 = arith.negf %44 : vector<8x192xf32>
    %46 = math.exp %45 : vector<8x192xf32>
    %cst_22 = arith.constant 1.000000e+00 : f32
    %47 = vector.broadcast %cst_22 : f32 to vector<8x192xf32>
    %48 = arith.addf %47, %46 : vector<8x192xf32>
    %49 = arith.divf %47, %48 : vector<8x192xf32>
    %50 = vector.extract_strided_slice %49 {offsets = [0, 0], sizes = [8, 64], strides = [1, 1]} : vector<8x192xf32> to vector<8x64xf32>
    %51 = vector.extract_strided_slice %49 {offsets = [0, 64], sizes = [8, 64], strides = [1, 1]} : vector<8x192xf32> to vector<8x64xf32>
    %52 = vector.extract_strided_slice %49 {offsets = [0, 128], sizes = [8, 64], strides = [1, 1]} : vector<8x192xf32> to vector<8x64xf32>
    %53 = vector.extract_strided_slice %43 {offsets = [0, 192], sizes = [8, 64], strides = [1, 1]} : vector<8x256xf32> to vector<8x64xf32>
    %54 = math.tanh %53 : vector<8x64xf32>
    %55 = arith.mulf %51, %33 : vector<8x64xf32>
    %56 = arith.mulf %50, %54 : vector<8x64xf32>
    %57 = arith.addf %55, %56 : vector<8x64xf32>
    %58 = math.tanh %57 : vector<8x64xf32>
    %59 = arith.mulf %52, %58 : vector<8x64xf32>
    %c0_i32_23 = arith.constant 0 : i32
    %c11_i32 = arith.constant 11 : i32
    %60 = vector.broadcast %c0_i32_23 : i32 to vector<1x64xi32>
    %61 = vector.broadcast %c11_i32 : i32 to vector<1x64xi32>
    %62 = arith.select %12, %60, %61 : vector<1x64xi1>, vector<1x64xi32>
    %63 = vector.broadcast %5 : vector<8x1xi32> to vector<8x64xi32>
    %64 = vector.broadcast %62 : vector<1x64xi32> to vector<8x64xi32>
    %65 = arith.cmpi sgt, %63, %64 : vector<8x64xi32>
    %66 = arith.truncf %59 : vector<8x64xf32> to vector<8x64xbf16>
    %67 = arith.select %65, %66, %32 : vector<8x64xi1>, vector<8x64xbf16>
    %68 = arith.select %65, %57, %33 : vector<8x64xi1>, vector<8x64xf32>
    %69 = arith.maximumf %34, %59 : vector<8x64xf32>
    %70 = arith.select %65, %69, %34 : vector<8x64xi1>, vector<8x64xf32>
    %c8 = arith.constant 8 : index
    %c0_24 = arith.constant 0 : index
    %71 = vector.load %arg10[%c8, %c0_24] : memref<96x256xbf16, #tpu.memory_space<vmem>>, vector<8x256xbf16>
    %c80 = arith.constant 80 : index
    %c0_25 = arith.constant 0 : index
    %72 = vector.load %arg10[%c80, %c0_25] : memref<96x256xbf16, #tpu.memory_space<vmem>>, vector<8x256xbf16>
    %73 = vector.shape_cast %31 : vector<1x256xi1> to vector<1x256xi1>
    %74 = vector.broadcast %73 : vector<1x256xi1> to vector<8x256xi1>
    %75 = arith.select %74, %71, %72 : vector<8x256xi1>, vector<8x256xbf16>
    %76 = arith.extf %75 : vector<8x256xbf16> to vector<8x256xf32>
    %77 = arith.addf %76, %9 : vector<8x256xf32>
    %cst_26 = arith.constant dense<0.000000e+00> : vector<8x256xf32>
    %78 = tpu.matmul %67, %6, %cst_26 {dimension_numbers = #tpu.dot_dimension_numbers<[1], [0], [0], [1], [0, 0, 1, 1], [], []>} : vector<8x64xbf16>, vector<64x256xbf16>, vector<8x256xf32> -> vector<8x256xf32>
    %79 = arith.addf %77, %78 : vector<8x256xf32>
    %80 = vector.extract_strided_slice %79 {offsets = [0, 0], sizes = [8, 192], strides = [1, 1]} : vector<8x256xf32> to vector<8x192xf32>
    %81 = arith.negf %80 : vector<8x192xf32>
    %82 = math.exp %81 : vector<8x192xf32>
    %cst_27 = arith.constant 1.000000e+00 : f32
    %83 = vector.broadcast %cst_27 : f32 to vector<8x192xf32>
    %84 = arith.addf %83, %82 : vector<8x192xf32>
    %85 = arith.divf %83, %84 : vector<8x192xf32>
    %86 = vector.extract_strided_slice %85 {offsets = [0, 0], sizes = [8, 64], strides = [1, 1]} : vector<8x192xf32> to vector<8x64xf32>
    %87 = vector.extract_strided_slice %85 {offsets = [0, 64], sizes = [8, 64], strides = [1, 1]} : vector<8x192xf32> to vector<8x64xf32>
    %88 = vector.extract_strided_slice %85 {offsets = [0, 128], sizes = [8, 64], strides = [1, 1]} : vector<8x192xf32> to vector<8x64xf32>
    %89 = vector.extract_strided_slice %79 {offsets = [0, 192], sizes = [8, 64], strides = [1, 1]} : vector<8x256xf32> to vector<8x64xf32>
    %90 = math.tanh %89 : vector<8x64xf32>
    %91 = arith.mulf %87, %68 : vector<8x64xf32>
    %92 = arith.mulf %86, %90 : vector<8x64xf32>
    %93 = arith.addf %91, %92 : vector<8x64xf32>
    %94 = math.tanh %93 : vector<8x64xf32>
    %95 = arith.mulf %88, %94 : vector<8x64xf32>
    %c1_i32_28 = arith.constant 1 : i32
    %c10_i32 = arith.constant 10 : i32
    %96 = vector.broadcast %c1_i32_28 : i32 to vector<1x64xi32>
    %97 = vector.broadcast %c10_i32 : i32 to vector<1x64xi32>
    %98 = arith.select %12, %96, %97 : vector<1x64xi1>, vector<1x64xi32>
    %99 = vector.broadcast %5 : vector<8x1xi32> to vector<8x64xi32>
    %100 = vector.broadcast %98 : vector<1x64xi32> to vector<8x64xi32>
    %101 = arith.cmpi sgt, %99, %100 : vector<8x64xi32>
    %102 = arith.truncf %95 : vector<8x64xf32> to vector<8x64xbf16>
    %103 = arith.select %101, %102, %67 : vector<8x64xi1>, vector<8x64xbf16>
    %104 = arith.select %101, %93, %68 : vector<8x64xi1>, vector<8x64xf32>
    %105 = arith.maximumf %70, %95 : vector<8x64xf32>
    %106 = arith.select %101, %105, %70 : vector<8x64xi1>, vector<8x64xf32>
    %c16 = arith.constant 16 : index
    %c0_29 = arith.constant 0 : index
    %107 = vector.load %arg10[%c16, %c0_29] : memref<96x256xbf16, #tpu.memory_space<vmem>>, vector<8x256xbf16>
    %c72 = arith.constant 72 : index
    %c0_30 = arith.constant 0 : index
    %108 = vector.load %arg10[%c72, %c0_30] : memref<96x256xbf16, #tpu.memory_space<vmem>>, vector<8x256xbf16>
    %109 = vector.shape_cast %31 : vector<1x256xi1> to vector<1x256xi1>
    %110 = vector.broadcast %109 : vector<1x256xi1> to vector<8x256xi1>
    %111 = arith.select %110, %107, %108 : vector<8x256xi1>, vector<8x256xbf16>
    %112 = arith.extf %111 : vector<8x256xbf16> to vector<8x256xf32>
    %113 = arith.addf %112, %9 : vector<8x256xf32>
    %cst_31 = arith.constant dense<0.000000e+00> : vector<8x256xf32>
    %114 = tpu.matmul %103, %6, %cst_31 {dimension_numbers = #tpu.dot_dimension_numbers<[1], [0], [0], [1], [0, 0, 1, 1], [], []>} : vector<8x64xbf16>, vector<64x256xbf16>, vector<8x256xf32> -> vector<8x256xf32>
    %115 = arith.addf %113, %114 : vector<8x256xf32>
    %116 = vector.extract_strided_slice %115 {offsets = [0, 0], sizes = [8, 192], strides = [1, 1]} : vector<8x256xf32> to vector<8x192xf32>
    %117 = arith.negf %116 : vector<8x192xf32>
    %118 = math.exp %117 : vector<8x192xf32>
    %cst_32 = arith.constant 1.000000e+00 : f32
    %119 = vector.broadcast %cst_32 : f32 to vector<8x192xf32>
    %120 = arith.addf %119, %118 : vector<8x192xf32>
    %121 = arith.divf %119, %120 : vector<8x192xf32>
    %122 = vector.extract_strided_slice %121 {offsets = [0, 0], sizes = [8, 64], strides = [1, 1]} : vector<8x192xf32> to vector<8x64xf32>
    %123 = vector.extract_strided_slice %121 {offsets = [0, 64], sizes = [8, 64], strides = [1, 1]} : vector<8x192xf32> to vector<8x64xf32>
    %124 = vector.extract_strided_slice %121 {offsets = [0, 128], sizes = [8, 64], strides = [1, 1]} : vector<8x192xf32> to vector<8x64xf32>
    %125 = vector.extract_strided_slice %115 {offsets = [0, 192], sizes = [8, 64], strides = [1, 1]} : vector<8x256xf32> to vector<8x64xf32>
    %126 = math.tanh %125 : vector<8x64xf32>
    %127 = arith.mulf %123, %104 : vector<8x64xf32>
    %128 = arith.mulf %122, %126 : vector<8x64xf32>
    %129 = arith.addf %127, %128 : vector<8x64xf32>
    %130 = math.tanh %129 : vector<8x64xf32>
    %131 = arith.mulf %124, %130 : vector<8x64xf32>
    %c2_i32 = arith.constant 2 : i32
    %c9_i32 = arith.constant 9 : i32
    %132 = vector.broadcast %c2_i32 : i32 to vector<1x64xi32>
    %133 = vector.broadcast %c9_i32 : i32 to vector<1x64xi32>
    %134 = arith.select %12, %132, %133 : vector<1x64xi1>, vector<1x64xi32>
    %135 = vector.broadcast %5 : vector<8x1xi32> to vector<8x64xi32>
    %136 = vector.broadcast %134 : vector<1x64xi32> to vector<8x64xi32>
    %137 = arith.cmpi sgt, %135, %136 : vector<8x64xi32>
    %138 = arith.truncf %131 : vector<8x64xf32> to vector<8x64xbf16>
    %139 = arith.select %137, %138, %103 : vector<8x64xi1>, vector<8x64xbf16>
    %140 = arith.select %137, %129, %104 : vector<8x64xi1>, vector<8x64xf32>
    %141 = arith.maximumf %106, %131 : vector<8x64xf32>
    %142 = arith.select %137, %141, %106 : vector<8x64xi1>, vector<8x64xf32>
    %c24 = arith.constant 24 : index
    %c0_33 = arith.constant 0 : index
    %143 = vector.load %arg10[%c24, %c0_33] : memref<96x256xbf16, #tpu.memory_space<vmem>>, vector<8x256xbf16>
    %c64 = arith.constant 64 : index
    %c0_34 = arith.constant 0 : index
    %144 = vector.load %arg10[%c64, %c0_34] : memref<96x256xbf16, #tpu.memory_space<vmem>>, vector<8x256xbf16>
    %145 = vector.shape_cast %31 : vector<1x256xi1> to vector<1x256xi1>
    %146 = vector.broadcast %145 : vector<1x256xi1> to vector<8x256xi1>
    %147 = arith.select %146, %143, %144 : vector<8x256xi1>, vector<8x256xbf16>
    %148 = arith.extf %147 : vector<8x256xbf16> to vector<8x256xf32>
    %149 = arith.addf %148, %9 : vector<8x256xf32>
    %cst_35 = arith.constant dense<0.000000e+00> : vector<8x256xf32>
    %150 = tpu.matmul %139, %6, %cst_35 {dimension_numbers = #tpu.dot_dimension_numbers<[1], [0], [0], [1], [0, 0, 1, 1], [], []>} : vector<8x64xbf16>, vector<64x256xbf16>, vector<8x256xf32> -> vector<8x256xf32>
    %151 = arith.addf %149, %150 : vector<8x256xf32>
    %152 = vector.extract_strided_slice %151 {offsets = [0, 0], sizes = [8, 192], strides = [1, 1]} : vector<8x256xf32> to vector<8x192xf32>
    %153 = arith.negf %152 : vector<8x192xf32>
    %154 = math.exp %153 : vector<8x192xf32>
    %cst_36 = arith.constant 1.000000e+00 : f32
    %155 = vector.broadcast %cst_36 : f32 to vector<8x192xf32>
    %156 = arith.addf %155, %154 : vector<8x192xf32>
    %157 = arith.divf %155, %156 : vector<8x192xf32>
    %158 = vector.extract_strided_slice %157 {offsets = [0, 0], sizes = [8, 64], strides = [1, 1]} : vector<8x192xf32> to vector<8x64xf32>
    %159 = vector.extract_strided_slice %157 {offsets = [0, 64], sizes = [8, 64], strides = [1, 1]} : vector<8x192xf32> to vector<8x64xf32>
    %160 = vector.extract_strided_slice %157 {offsets = [0, 128], sizes = [8, 64], strides = [1, 1]} : vector<8x192xf32> to vector<8x64xf32>
    %161 = vector.extract_strided_slice %151 {offsets = [0, 192], sizes = [8, 64], strides = [1, 1]} : vector<8x256xf32> to vector<8x64xf32>
    %162 = math.tanh %161 : vector<8x64xf32>
    %163 = arith.mulf %159, %140 : vector<8x64xf32>
    %164 = arith.mulf %158, %162 : vector<8x64xf32>
    %165 = arith.addf %163, %164 : vector<8x64xf32>
    %166 = math.tanh %165 : vector<8x64xf32>
    %167 = arith.mulf %160, %166 : vector<8x64xf32>
    %c3_i32 = arith.constant 3 : i32
    %c8_i32 = arith.constant 8 : i32
    %168 = vector.broadcast %c3_i32 : i32 to vector<1x64xi32>
    %169 = vector.broadcast %c8_i32 : i32 to vector<1x64xi32>
    %170 = arith.select %12, %168, %169 : vector<1x64xi1>, vector<1x64xi32>
    %171 = vector.broadcast %5 : vector<8x1xi32> to vector<8x64xi32>
    %172 = vector.broadcast %170 : vector<1x64xi32> to vector<8x64xi32>
    %173 = arith.cmpi sgt, %171, %172 : vector<8x64xi32>
    %174 = arith.truncf %167 : vector<8x64xf32> to vector<8x64xbf16>
    %175 = arith.select %173, %174, %139 : vector<8x64xi1>, vector<8x64xbf16>
    %176 = arith.select %173, %165, %140 : vector<8x64xi1>, vector<8x64xf32>
    %177 = arith.maximumf %142, %167 : vector<8x64xf32>
    %178 = arith.select %173, %177, %142 : vector<8x64xi1>, vector<8x64xf32>
    %c32 = arith.constant 32 : index
    %c0_37 = arith.constant 0 : index
    %179 = vector.load %arg10[%c32, %c0_37] : memref<96x256xbf16, #tpu.memory_space<vmem>>, vector<8x256xbf16>
    %c56 = arith.constant 56 : index
    %c0_38 = arith.constant 0 : index
    %180 = vector.load %arg10[%c56, %c0_38] : memref<96x256xbf16, #tpu.memory_space<vmem>>, vector<8x256xbf16>
    %181 = vector.shape_cast %31 : vector<1x256xi1> to vector<1x256xi1>
    %182 = vector.broadcast %181 : vector<1x256xi1> to vector<8x256xi1>
    %183 = arith.select %182, %179, %180 : vector<8x256xi1>, vector<8x256xbf16>
    %184 = arith.extf %183 : vector<8x256xbf16> to vector<8x256xf32>
    %185 = arith.addf %184, %9 : vector<8x256xf32>
    %cst_39 = arith.constant dense<0.000000e+00> : vector<8x256xf32>
    %186 = tpu.matmul %175, %6, %cst_39 {dimension_numbers = #tpu.dot_dimension_numbers<[1], [0], [0], [1], [0, 0, 1, 1], [], []>} : vector<8x64xbf16>, vector<64x256xbf16>, vector<8x256xf32> -> vector<8x256xf32>
    %187 = arith.addf %185, %186 : vector<8x256xf32>
    %188 = vector.extract_strided_slice %187 {offsets = [0, 0], sizes = [8, 192], strides = [1, 1]} : vector<8x256xf32> to vector<8x192xf32>
    %189 = arith.negf %188 : vector<8x192xf32>
    %190 = math.exp %189 : vector<8x192xf32>
    %cst_40 = arith.constant 1.000000e+00 : f32
    %191 = vector.broadcast %cst_40 : f32 to vector<8x192xf32>
    %192 = arith.addf %191, %190 : vector<8x192xf32>
    %193 = arith.divf %191, %192 : vector<8x192xf32>
    %194 = vector.extract_strided_slice %193 {offsets = [0, 0], sizes = [8, 64], strides = [1, 1]} : vector<8x192xf32> to vector<8x64xf32>
    %195 = vector.extract_strided_slice %193 {offsets = [0, 64], sizes = [8, 64], strides = [1, 1]} : vector<8x192xf32> to vector<8x64xf32>
    %196 = vector.extract_strided_slice %193 {offsets = [0, 128], sizes = [8, 64], strides = [1, 1]} : vector<8x192xf32> to vector<8x64xf32>
    %197 = vector.extract_strided_slice %187 {offsets = [0, 192], sizes = [8, 64], strides = [1, 1]} : vector<8x256xf32> to vector<8x64xf32>
    %198 = math.tanh %197 : vector<8x64xf32>
    %199 = arith.mulf %195, %176 : vector<8x64xf32>
    %200 = arith.mulf %194, %198 : vector<8x64xf32>
    %201 = arith.addf %199, %200 : vector<8x64xf32>
    %202 = math.tanh %201 : vector<8x64xf32>
    %203 = arith.mulf %196, %202 : vector<8x64xf32>
    %c4_i32 = arith.constant 4 : i32
    %c7_i32 = arith.constant 7 : i32
    %204 = vector.broadcast %c4_i32 : i32 to vector<1x64xi32>
    %205 = vector.broadcast %c7_i32 : i32 to vector<1x64xi32>
    %206 = arith.select %12, %204, %205 : vector<1x64xi1>, vector<1x64xi32>
    %207 = vector.broadcast %5 : vector<8x1xi32> to vector<8x64xi32>
    %208 = vector.broadcast %206 : vector<1x64xi32> to vector<8x64xi32>
    %209 = arith.cmpi sgt, %207, %208 : vector<8x64xi32>
    %210 = arith.truncf %203 : vector<8x64xf32> to vector<8x64xbf16>
    %211 = arith.select %209, %210, %175 : vector<8x64xi1>, vector<8x64xbf16>
    %212 = arith.select %209, %201, %176 : vector<8x64xi1>, vector<8x64xf32>
    %213 = arith.maximumf %178, %203 : vector<8x64xf32>
    %214 = arith.select %209, %213, %178 : vector<8x64xi1>, vector<8x64xf32>
    %c40 = arith.constant 40 : index
    %c0_41 = arith.constant 0 : index
    %215 = vector.load %arg10[%c40, %c0_41] : memref<96x256xbf16, #tpu.memory_space<vmem>>, vector<8x256xbf16>
    %c48 = arith.constant 48 : index
    %c0_42 = arith.constant 0 : index
    %216 = vector.load %arg10[%c48, %c0_42] : memref<96x256xbf16, #tpu.memory_space<vmem>>, vector<8x256xbf16>
    %217 = vector.shape_cast %31 : vector<1x256xi1> to vector<1x256xi1>
    %218 = vector.broadcast %217 : vector<1x256xi1> to vector<8x256xi1>
    %219 = arith.select %218, %215, %216 : vector<8x256xi1>, vector<8x256xbf16>
    %220 = arith.extf %219 : vector<8x256xbf16> to vector<8x256xf32>
    %221 = arith.addf %220, %9 : vector<8x256xf32>
    %cst_43 = arith.constant dense<0.000000e+00> : vector<8x256xf32>
    %222 = tpu.matmul %211, %6, %cst_43 {dimension_numbers = #tpu.dot_dimension_numbers<[1], [0], [0], [1], [0, 0, 1, 1], [], []>} : vector<8x64xbf16>, vector<64x256xbf16>, vector<8x256xf32> -> vector<8x256xf32>
    %223 = arith.addf %221, %222 : vector<8x256xf32>
    %224 = vector.extract_strided_slice %223 {offsets = [0, 0], sizes = [8, 192], strides = [1, 1]} : vector<8x256xf32> to vector<8x192xf32>
    %225 = arith.negf %224 : vector<8x192xf32>
    %226 = math.exp %225 : vector<8x192xf32>
    %cst_44 = arith.constant 1.000000e+00 : f32
    %227 = vector.broadcast %cst_44 : f32 to vector<8x192xf32>
    %228 = arith.addf %227, %226 : vector<8x192xf32>
    %229 = arith.divf %227, %228 : vector<8x192xf32>
    %230 = vector.extract_strided_slice %229 {offsets = [0, 0], sizes = [8, 64], strides = [1, 1]} : vector<8x192xf32> to vector<8x64xf32>
    %231 = vector.extract_strided_slice %229 {offsets = [0, 64], sizes = [8, 64], strides = [1, 1]} : vector<8x192xf32> to vector<8x64xf32>
    %232 = vector.extract_strided_slice %229 {offsets = [0, 128], sizes = [8, 64], strides = [1, 1]} : vector<8x192xf32> to vector<8x64xf32>
    %233 = vector.extract_strided_slice %223 {offsets = [0, 192], sizes = [8, 64], strides = [1, 1]} : vector<8x256xf32> to vector<8x64xf32>
    %234 = math.tanh %233 : vector<8x64xf32>
    %235 = arith.mulf %231, %212 : vector<8x64xf32>
    %236 = arith.mulf %230, %234 : vector<8x64xf32>
    %237 = arith.addf %235, %236 : vector<8x64xf32>
    %238 = math.tanh %237 : vector<8x64xf32>
    %239 = arith.mulf %232, %238 : vector<8x64xf32>
    %c5_i32 = arith.constant 5 : i32
    %c6_i32 = arith.constant 6 : i32
    %240 = vector.broadcast %c5_i32 : i32 to vector<1x64xi32>
    %241 = vector.broadcast %c6_i32 : i32 to vector<1x64xi32>
    %242 = arith.select %12, %240, %241 : vector<1x64xi1>, vector<1x64xi32>
    %243 = vector.broadcast %5 : vector<8x1xi32> to vector<8x64xi32>
    %244 = vector.broadcast %242 : vector<1x64xi32> to vector<8x64xi32>
    %245 = arith.cmpi sgt, %243, %244 : vector<8x64xi32>
    %246 = arith.truncf %239 : vector<8x64xf32> to vector<8x64xbf16>
    %247 = arith.select %245, %246, %211 : vector<8x64xi1>, vector<8x64xbf16>
    %248 = arith.select %245, %237, %212 : vector<8x64xi1>, vector<8x64xf32>
    %249 = arith.maximumf %214, %239 : vector<8x64xf32>
    %250 = arith.select %245, %249, %214 : vector<8x64xi1>, vector<8x64xf32>
    %c48_45 = arith.constant 48 : index
    %c0_46 = arith.constant 0 : index
    %251 = vector.load %arg10[%c48_45, %c0_46] : memref<96x256xbf16, #tpu.memory_space<vmem>>, vector<8x256xbf16>
    %c40_47 = arith.constant 40 : index
    %c0_48 = arith.constant 0 : index
    %252 = vector.load %arg10[%c40_47, %c0_48] : memref<96x256xbf16, #tpu.memory_space<vmem>>, vector<8x256xbf16>
    %253 = vector.shape_cast %31 : vector<1x256xi1> to vector<1x256xi1>
    %254 = vector.broadcast %253 : vector<1x256xi1> to vector<8x256xi1>
    %255 = arith.select %254, %251, %252 : vector<8x256xi1>, vector<8x256xbf16>
    %256 = arith.extf %255 : vector<8x256xbf16> to vector<8x256xf32>
    %257 = arith.addf %256, %9 : vector<8x256xf32>
    %cst_49 = arith.constant dense<0.000000e+00> : vector<8x256xf32>
    %258 = tpu.matmul %247, %6, %cst_49 {dimension_numbers = #tpu.dot_dimension_numbers<[1], [0], [0], [1], [0, 0, 1, 1], [], []>} : vector<8x64xbf16>, vector<64x256xbf16>, vector<8x256xf32> -> vector<8x256xf32>
    %259 = arith.addf %257, %258 : vector<8x256xf32>
    %260 = vector.extract_strided_slice %259 {offsets = [0, 0], sizes = [8, 192], strides = [1, 1]} : vector<8x256xf32> to vector<8x192xf32>
    %261 = arith.negf %260 : vector<8x192xf32>
    %262 = math.exp %261 : vector<8x192xf32>
    %cst_50 = arith.constant 1.000000e+00 : f32
    %263 = vector.broadcast %cst_50 : f32 to vector<8x192xf32>
    %264 = arith.addf %263, %262 : vector<8x192xf32>
    %265 = arith.divf %263, %264 : vector<8x192xf32>
    %266 = vector.extract_strided_slice %265 {offsets = [0, 0], sizes = [8, 64], strides = [1, 1]} : vector<8x192xf32> to vector<8x64xf32>
    %267 = vector.extract_strided_slice %265 {offsets = [0, 64], sizes = [8, 64], strides = [1, 1]} : vector<8x192xf32> to vector<8x64xf32>
    %268 = vector.extract_strided_slice %265 {offsets = [0, 128], sizes = [8, 64], strides = [1, 1]} : vector<8x192xf32> to vector<8x64xf32>
    %269 = vector.extract_strided_slice %259 {offsets = [0, 192], sizes = [8, 64], strides = [1, 1]} : vector<8x256xf32> to vector<8x64xf32>
    %270 = math.tanh %269 : vector<8x64xf32>
    %271 = arith.mulf %267, %248 : vector<8x64xf32>
    %272 = arith.mulf %266, %270 : vector<8x64xf32>
    %273 = arith.addf %271, %272 : vector<8x64xf32>
    %274 = math.tanh %273 : vector<8x64xf32>
    %275 = arith.mulf %268, %274 : vector<8x64xf32>
    %c6_i32_51 = arith.constant 6 : i32
    %c5_i32_52 = arith.constant 5 : i32
    %276 = vector.broadcast %c6_i32_51 : i32 to vector<1x64xi32>
    %277 = vector.broadcast %c5_i32_52 : i32 to vector<1x64xi32>
    %278 = arith.select %12, %276, %277 : vector<1x64xi1>, vector<1x64xi32>
    %279 = vector.broadcast %5 : vector<8x1xi32> to vector<8x64xi32>
    %280 = vector.broadcast %278 : vector<1x64xi32> to vector<8x64xi32>
    %281 = arith.cmpi sgt, %279, %280 : vector<8x64xi32>
    %282 = arith.truncf %275 : vector<8x64xf32> to vector<8x64xbf16>
    %283 = arith.select %281, %282, %247 : vector<8x64xi1>, vector<8x64xbf16>
    %284 = arith.select %281, %273, %248 : vector<8x64xi1>, vector<8x64xf32>
    %285 = arith.maximumf %250, %275 : vector<8x64xf32>
    %286 = arith.select %281, %285, %250 : vector<8x64xi1>, vector<8x64xf32>
    %c56_53 = arith.constant 56 : index
    %c0_54 = arith.constant 0 : index
    %287 = vector.load %arg10[%c56_53, %c0_54] : memref<96x256xbf16, #tpu.memory_space<vmem>>, vector<8x256xbf16>
    %c32_55 = arith.constant 32 : index
    %c0_56 = arith.constant 0 : index
    %288 = vector.load %arg10[%c32_55, %c0_56] : memref<96x256xbf16, #tpu.memory_space<vmem>>, vector<8x256xbf16>
    %289 = vector.shape_cast %31 : vector<1x256xi1> to vector<1x256xi1>
    %290 = vector.broadcast %289 : vector<1x256xi1> to vector<8x256xi1>
    %291 = arith.select %290, %287, %288 : vector<8x256xi1>, vector<8x256xbf16>
    %292 = arith.extf %291 : vector<8x256xbf16> to vector<8x256xf32>
    %293 = arith.addf %292, %9 : vector<8x256xf32>
    %cst_57 = arith.constant dense<0.000000e+00> : vector<8x256xf32>
    %294 = tpu.matmul %283, %6, %cst_57 {dimension_numbers = #tpu.dot_dimension_numbers<[1], [0], [0], [1], [0, 0, 1, 1], [], []>} : vector<8x64xbf16>, vector<64x256xbf16>, vector<8x256xf32> -> vector<8x256xf32>
    %295 = arith.addf %293, %294 : vector<8x256xf32>
    %296 = vector.extract_strided_slice %295 {offsets = [0, 0], sizes = [8, 192], strides = [1, 1]} : vector<8x256xf32> to vector<8x192xf32>
    %297 = arith.negf %296 : vector<8x192xf32>
    %298 = math.exp %297 : vector<8x192xf32>
    %cst_58 = arith.constant 1.000000e+00 : f32
    %299 = vector.broadcast %cst_58 : f32 to vector<8x192xf32>
    %300 = arith.addf %299, %298 : vector<8x192xf32>
    %301 = arith.divf %299, %300 : vector<8x192xf32>
    %302 = vector.extract_strided_slice %301 {offsets = [0, 0], sizes = [8, 64], strides = [1, 1]} : vector<8x192xf32> to vector<8x64xf32>
    %303 = vector.extract_strided_slice %301 {offsets = [0, 64], sizes = [8, 64], strides = [1, 1]} : vector<8x192xf32> to vector<8x64xf32>
    %304 = vector.extract_strided_slice %301 {offsets = [0, 128], sizes = [8, 64], strides = [1, 1]} : vector<8x192xf32> to vector<8x64xf32>
    %305 = vector.extract_strided_slice %295 {offsets = [0, 192], sizes = [8, 64], strides = [1, 1]} : vector<8x256xf32> to vector<8x64xf32>
    %306 = math.tanh %305 : vector<8x64xf32>
    %307 = arith.mulf %303, %284 : vector<8x64xf32>
    %308 = arith.mulf %302, %306 : vector<8x64xf32>
    %309 = arith.addf %307, %308 : vector<8x64xf32>
    %310 = math.tanh %309 : vector<8x64xf32>
    %311 = arith.mulf %304, %310 : vector<8x64xf32>
    %c7_i32_59 = arith.constant 7 : i32
    %c4_i32_60 = arith.constant 4 : i32
    %312 = vector.broadcast %c7_i32_59 : i32 to vector<1x64xi32>
    %313 = vector.broadcast %c4_i32_60 : i32 to vector<1x64xi32>
    %314 = arith.select %12, %312, %313 : vector<1x64xi1>, vector<1x64xi32>
    %315 = vector.broadcast %5 : vector<8x1xi32> to vector<8x64xi32>
    %316 = vector.broadcast %314 : vector<1x64xi32> to vector<8x64xi32>
    %317 = arith.cmpi sgt, %315, %316 : vector<8x64xi32>
    %318 = arith.truncf %311 : vector<8x64xf32> to vector<8x64xbf16>
    %319 = arith.select %317, %318, %283 : vector<8x64xi1>, vector<8x64xbf16>
    %320 = arith.select %317, %309, %284 : vector<8x64xi1>, vector<8x64xf32>
    %321 = arith.maximumf %286, %311 : vector<8x64xf32>
    %322 = arith.select %317, %321, %286 : vector<8x64xi1>, vector<8x64xf32>
    %c64_61 = arith.constant 64 : index
    %c0_62 = arith.constant 0 : index
    %323 = vector.load %arg10[%c64_61, %c0_62] : memref<96x256xbf16, #tpu.memory_space<vmem>>, vector<8x256xbf16>
    %c24_63 = arith.constant 24 : index
    %c0_64 = arith.constant 0 : index
    %324 = vector.load %arg10[%c24_63, %c0_64] : memref<96x256xbf16, #tpu.memory_space<vmem>>, vector<8x256xbf16>
    %325 = vector.shape_cast %31 : vector<1x256xi1> to vector<1x256xi1>
    %326 = vector.broadcast %325 : vector<1x256xi1> to vector<8x256xi1>
    %327 = arith.select %326, %323, %324 : vector<8x256xi1>, vector<8x256xbf16>
    %328 = arith.extf %327 : vector<8x256xbf16> to vector<8x256xf32>
    %329 = arith.addf %328, %9 : vector<8x256xf32>
    %cst_65 = arith.constant dense<0.000000e+00> : vector<8x256xf32>
    %330 = tpu.matmul %319, %6, %cst_65 {dimension_numbers = #tpu.dot_dimension_numbers<[1], [0], [0], [1], [0, 0, 1, 1], [], []>} : vector<8x64xbf16>, vector<64x256xbf16>, vector<8x256xf32> -> vector<8x256xf32>
    %331 = arith.addf %329, %330 : vector<8x256xf32>
    %332 = vector.extract_strided_slice %331 {offsets = [0, 0], sizes = [8, 192], strides = [1, 1]} : vector<8x256xf32> to vector<8x192xf32>
    %333 = arith.negf %332 : vector<8x192xf32>
    %334 = math.exp %333 : vector<8x192xf32>
    %cst_66 = arith.constant 1.000000e+00 : f32
    %335 = vector.broadcast %cst_66 : f32 to vector<8x192xf32>
    %336 = arith.addf %335, %334 : vector<8x192xf32>
    %337 = arith.divf %335, %336 : vector<8x192xf32>
    %338 = vector.extract_strided_slice %337 {offsets = [0, 0], sizes = [8, 64], strides = [1, 1]} : vector<8x192xf32> to vector<8x64xf32>
    %339 = vector.extract_strided_slice %337 {offsets = [0, 64], sizes = [8, 64], strides = [1, 1]} : vector<8x192xf32> to vector<8x64xf32>
    %340 = vector.extract_strided_slice %337 {offsets = [0, 128], sizes = [8, 64], strides = [1, 1]} : vector<8x192xf32> to vector<8x64xf32>
    %341 = vector.extract_strided_slice %331 {offsets = [0, 192], sizes = [8, 64], strides = [1, 1]} : vector<8x256xf32> to vector<8x64xf32>
    %342 = math.tanh %341 : vector<8x64xf32>
    %343 = arith.mulf %339, %320 : vector<8x64xf32>
    %344 = arith.mulf %338, %342 : vector<8x64xf32>
    %345 = arith.addf %343, %344 : vector<8x64xf32>
    %346 = math.tanh %345 : vector<8x64xf32>
    %347 = arith.mulf %340, %346 : vector<8x64xf32>
    %c8_i32_67 = arith.constant 8 : i32
    %c3_i32_68 = arith.constant 3 : i32
    %348 = vector.broadcast %c8_i32_67 : i32 to vector<1x64xi32>
    %349 = vector.broadcast %c3_i32_68 : i32 to vector<1x64xi32>
    %350 = arith.select %12, %348, %349 : vector<1x64xi1>, vector<1x64xi32>
    %351 = vector.broadcast %5 : vector<8x1xi32> to vector<8x64xi32>
    %352 = vector.broadcast %350 : vector<1x64xi32> to vector<8x64xi32>
    %353 = arith.cmpi sgt, %351, %352 : vector<8x64xi32>
    %354 = arith.truncf %347 : vector<8x64xf32> to vector<8x64xbf16>
    %355 = arith.select %353, %354, %319 : vector<8x64xi1>, vector<8x64xbf16>
    %356 = arith.select %353, %345, %320 : vector<8x64xi1>, vector<8x64xf32>
    %357 = arith.maximumf %322, %347 : vector<8x64xf32>
    %358 = arith.select %353, %357, %322 : vector<8x64xi1>, vector<8x64xf32>
    %c72_69 = arith.constant 72 : index
    %c0_70 = arith.constant 0 : index
    %359 = vector.load %arg10[%c72_69, %c0_70] : memref<96x256xbf16, #tpu.memory_space<vmem>>, vector<8x256xbf16>
    %c16_71 = arith.constant 16 : index
    %c0_72 = arith.constant 0 : index
    %360 = vector.load %arg10[%c16_71, %c0_72] : memref<96x256xbf16, #tpu.memory_space<vmem>>, vector<8x256xbf16>
    %361 = vector.shape_cast %31 : vector<1x256xi1> to vector<1x256xi1>
    %362 = vector.broadcast %361 : vector<1x256xi1> to vector<8x256xi1>
    %363 = arith.select %362, %359, %360 : vector<8x256xi1>, vector<8x256xbf16>
    %364 = arith.extf %363 : vector<8x256xbf16> to vector<8x256xf32>
    %365 = arith.addf %364, %9 : vector<8x256xf32>
    %cst_73 = arith.constant dense<0.000000e+00> : vector<8x256xf32>
    %366 = tpu.matmul %355, %6, %cst_73 {dimension_numbers = #tpu.dot_dimension_numbers<[1], [0], [0], [1], [0, 0, 1, 1], [], []>} : vector<8x64xbf16>, vector<64x256xbf16>, vector<8x256xf32> -> vector<8x256xf32>
    %367 = arith.addf %365, %366 : vector<8x256xf32>
    %368 = vector.extract_strided_slice %367 {offsets = [0, 0], sizes = [8, 192], strides = [1, 1]} : vector<8x256xf32> to vector<8x192xf32>
    %369 = arith.negf %368 : vector<8x192xf32>
    %370 = math.exp %369 : vector<8x192xf32>
    %cst_74 = arith.constant 1.000000e+00 : f32
    %371 = vector.broadcast %cst_74 : f32 to vector<8x192xf32>
    %372 = arith.addf %371, %370 : vector<8x192xf32>
    %373 = arith.divf %371, %372 : vector<8x192xf32>
    %374 = vector.extract_strided_slice %373 {offsets = [0, 0], sizes = [8, 64], strides = [1, 1]} : vector<8x192xf32> to vector<8x64xf32>
    %375 = vector.extract_strided_slice %373 {offsets = [0, 64], sizes = [8, 64], strides = [1, 1]} : vector<8x192xf32> to vector<8x64xf32>
    %376 = vector.extract_strided_slice %373 {offsets = [0, 128], sizes = [8, 64], strides = [1, 1]} : vector<8x192xf32> to vector<8x64xf32>
    %377 = vector.extract_strided_slice %367 {offsets = [0, 192], sizes = [8, 64], strides = [1, 1]} : vector<8x256xf32> to vector<8x64xf32>
    %378 = math.tanh %377 : vector<8x64xf32>
    %379 = arith.mulf %375, %356 : vector<8x64xf32>
    %380 = arith.mulf %374, %378 : vector<8x64xf32>
    %381 = arith.addf %379, %380 : vector<8x64xf32>
    %382 = math.tanh %381 : vector<8x64xf32>
    %383 = arith.mulf %376, %382 : vector<8x64xf32>
    %c9_i32_75 = arith.constant 9 : i32
    %c2_i32_76 = arith.constant 2 : i32
    %384 = vector.broadcast %c9_i32_75 : i32 to vector<1x64xi32>
    %385 = vector.broadcast %c2_i32_76 : i32 to vector<1x64xi32>
    %386 = arith.select %12, %384, %385 : vector<1x64xi1>, vector<1x64xi32>
    %387 = vector.broadcast %5 : vector<8x1xi32> to vector<8x64xi32>
    %388 = vector.broadcast %386 : vector<1x64xi32> to vector<8x64xi32>
    %389 = arith.cmpi sgt, %387, %388 : vector<8x64xi32>
    %390 = arith.truncf %383 : vector<8x64xf32> to vector<8x64xbf16>
    %391 = arith.select %389, %390, %355 : vector<8x64xi1>, vector<8x64xbf16>
    %392 = arith.select %389, %381, %356 : vector<8x64xi1>, vector<8x64xf32>
    %393 = arith.maximumf %358, %383 : vector<8x64xf32>
    %394 = arith.select %389, %393, %358 : vector<8x64xi1>, vector<8x64xf32>
    %c80_77 = arith.constant 80 : index
    %c0_78 = arith.constant 0 : index
    %395 = vector.load %arg10[%c80_77, %c0_78] : memref<96x256xbf16, #tpu.memory_space<vmem>>, vector<8x256xbf16>
    %c8_79 = arith.constant 8 : index
    %c0_80 = arith.constant 0 : index
    %396 = vector.load %arg10[%c8_79, %c0_80] : memref<96x256xbf16, #tpu.memory_space<vmem>>, vector<8x256xbf16>
    %397 = vector.shape_cast %31 : vector<1x256xi1> to vector<1x256xi1>
    %398 = vector.broadcast %397 : vector<1x256xi1> to vector<8x256xi1>
    %399 = arith.select %398, %395, %396 : vector<8x256xi1>, vector<8x256xbf16>
    %400 = arith.extf %399 : vector<8x256xbf16> to vector<8x256xf32>
    %401 = arith.addf %400, %9 : vector<8x256xf32>
    %cst_81 = arith.constant dense<0.000000e+00> : vector<8x256xf32>
    %402 = tpu.matmul %391, %6, %cst_81 {dimension_numbers = #tpu.dot_dimension_numbers<[1], [0], [0], [1], [0, 0, 1, 1], [], []>} : vector<8x64xbf16>, vector<64x256xbf16>, vector<8x256xf32> -> vector<8x256xf32>
    %403 = arith.addf %401, %402 : vector<8x256xf32>
    %404 = vector.extract_strided_slice %403 {offsets = [0, 0], sizes = [8, 192], strides = [1, 1]} : vector<8x256xf32> to vector<8x192xf32>
    %405 = arith.negf %404 : vector<8x192xf32>
    %406 = math.exp %405 : vector<8x192xf32>
    %cst_82 = arith.constant 1.000000e+00 : f32
    %407 = vector.broadcast %cst_82 : f32 to vector<8x192xf32>
    %408 = arith.addf %407, %406 : vector<8x192xf32>
    %409 = arith.divf %407, %408 : vector<8x192xf32>
    %410 = vector.extract_strided_slice %409 {offsets = [0, 0], sizes = [8, 64], strides = [1, 1]} : vector<8x192xf32> to vector<8x64xf32>
    %411 = vector.extract_strided_slice %409 {offsets = [0, 64], sizes = [8, 64], strides = [1, 1]} : vector<8x192xf32> to vector<8x64xf32>
    %412 = vector.extract_strided_slice %409 {offsets = [0, 128], sizes = [8, 64], strides = [1, 1]} : vector<8x192xf32> to vector<8x64xf32>
    %413 = vector.extract_strided_slice %403 {offsets = [0, 192], sizes = [8, 64], strides = [1, 1]} : vector<8x256xf32> to vector<8x64xf32>
    %414 = math.tanh %413 : vector<8x64xf32>
    %415 = arith.mulf %411, %392 : vector<8x64xf32>
    %416 = arith.mulf %410, %414 : vector<8x64xf32>
    %417 = arith.addf %415, %416 : vector<8x64xf32>
    %418 = math.tanh %417 : vector<8x64xf32>
    %419 = arith.mulf %412, %418 : vector<8x64xf32>
    %c10_i32_83 = arith.constant 10 : i32
    %c1_i32_84 = arith.constant 1 : i32
    %420 = vector.broadcast %c10_i32_83 : i32 to vector<1x64xi32>
    %421 = vector.broadcast %c1_i32_84 : i32 to vector<1x64xi32>
    %422 = arith.select %12, %420, %421 : vector<1x64xi1>, vector<1x64xi32>
    %423 = vector.broadcast %5 : vector<8x1xi32> to vector<8x64xi32>
    %424 = vector.broadcast %422 : vector<1x64xi32> to vector<8x64xi32>
    %425 = arith.cmpi sgt, %423, %424 : vector<8x64xi32>
    %426 = arith.truncf %419 : vector<8x64xf32> to vector<8x64xbf16>
    %427 = arith.select %425, %426, %391 : vector<8x64xi1>, vector<8x64xbf16>
    %428 = arith.select %425, %417, %392 : vector<8x64xi1>, vector<8x64xf32>
    %429 = arith.maximumf %394, %419 : vector<8x64xf32>
    %430 = arith.select %425, %429, %394 : vector<8x64xi1>, vector<8x64xf32>
    %c88_85 = arith.constant 88 : index
    %c0_86 = arith.constant 0 : index
    %431 = vector.load %arg10[%c88_85, %c0_86] : memref<96x256xbf16, #tpu.memory_space<vmem>>, vector<8x256xbf16>
    %c0_87 = arith.constant 0 : index
    %c0_88 = arith.constant 0 : index
    %432 = vector.load %arg10[%c0_87, %c0_88] : memref<96x256xbf16, #tpu.memory_space<vmem>>, vector<8x256xbf16>
    %433 = vector.shape_cast %31 : vector<1x256xi1> to vector<1x256xi1>
    %434 = vector.broadcast %433 : vector<1x256xi1> to vector<8x256xi1>
    %435 = arith.select %434, %431, %432 : vector<8x256xi1>, vector<8x256xbf16>
    %436 = arith.extf %435 : vector<8x256xbf16> to vector<8x256xf32>
    %437 = arith.addf %436, %9 : vector<8x256xf32>
    %cst_89 = arith.constant dense<0.000000e+00> : vector<8x256xf32>
    %438 = tpu.matmul %427, %6, %cst_89 {dimension_numbers = #tpu.dot_dimension_numbers<[1], [0], [0], [1], [0, 0, 1, 1], [], []>} : vector<8x64xbf16>, vector<64x256xbf16>, vector<8x256xf32> -> vector<8x256xf32>
    %439 = arith.addf %437, %438 : vector<8x256xf32>
    %440 = vector.extract_strided_slice %439 {offsets = [0, 0], sizes = [8, 192], strides = [1, 1]} : vector<8x256xf32> to vector<8x192xf32>
    %441 = arith.negf %440 : vector<8x192xf32>
    %442 = math.exp %441 : vector<8x192xf32>
    %cst_90 = arith.constant 1.000000e+00 : f32
    %443 = vector.broadcast %cst_90 : f32 to vector<8x192xf32>
    %444 = arith.addf %443, %442 : vector<8x192xf32>
    %445 = arith.divf %443, %444 : vector<8x192xf32>
    %446 = vector.extract_strided_slice %445 {offsets = [0, 0], sizes = [8, 64], strides = [1, 1]} : vector<8x192xf32> to vector<8x64xf32>
    %447 = vector.extract_strided_slice %445 {offsets = [0, 64], sizes = [8, 64], strides = [1, 1]} : vector<8x192xf32> to vector<8x64xf32>
    %448 = vector.extract_strided_slice %445 {offsets = [0, 128], sizes = [8, 64], strides = [1, 1]} : vector<8x192xf32> to vector<8x64xf32>
    %449 = vector.extract_strided_slice %439 {offsets = [0, 192], sizes = [8, 64], strides = [1, 1]} : vector<8x256xf32> to vector<8x64xf32>
    %450 = math.tanh %449 : vector<8x64xf32>
    %451 = arith.mulf %447, %428 : vector<8x64xf32>
    %452 = arith.mulf %446, %450 : vector<8x64xf32>
    %453 = arith.addf %451, %452 : vector<8x64xf32>
    %454 = math.tanh %453 : vector<8x64xf32>
    %455 = arith.mulf %448, %454 : vector<8x64xf32>
    %c11_i32_91 = arith.constant 11 : i32
    %c0_i32_92 = arith.constant 0 : i32
    %456 = vector.broadcast %c11_i32_91 : i32 to vector<1x64xi32>
    %457 = vector.broadcast %c0_i32_92 : i32 to vector<1x64xi32>
    %458 = arith.select %12, %456, %457 : vector<1x64xi1>, vector<1x64xi32>
    %459 = vector.broadcast %5 : vector<8x1xi32> to vector<8x64xi32>
    %460 = vector.broadcast %458 : vector<1x64xi32> to vector<8x64xi32>
    %461 = arith.cmpi sgt, %459, %460 : vector<8x64xi32>
    %462 = arith.maximumf %430, %455 : vector<8x64xf32>
    %463 = arith.select %461, %462, %430 : vector<8x64xi1>, vector<8x64xf32>
    %c0_i32_93 = arith.constant 0 : i32
    %464 = vector.broadcast %c0_i32_93 : i32 to vector<8x1xi32>
    %465 = arith.cmpi sgt, %5, %464 : vector<8x1xi32>
    %cst_94 = arith.constant 0.000000e+00 : f32
    %466 = vector.shape_cast %465 : vector<8x1xi1> to vector<8x1xi1>
    %467 = vector.broadcast %466 : vector<8x1xi1> to vector<8x64xi1>
    %468 = vector.broadcast %cst_94 : f32 to vector<8x64xf32>
    %469 = arith.select %467, %463, %468 : vector<8x64xi1>, vector<8x64xf32>
    %470 = vector.extract_strided_slice %469 {offsets = [4, 0], sizes = [4, 64], strides = [1, 1]} : vector<8x64xf32> to vector<4x64xf32>
    %471 = vector.extract_strided_slice %469 {offsets = [0, 0], sizes = [4, 64], strides = [1, 1]} : vector<8x64xf32> to vector<4x64xf32>
    %472 = tpu.concatenate %470, %471 in 0 : vector<4x64xf32>, vector<4x64xf32> -> vector<8x64xf32>
    %473 = arith.subf %469, %472 : vector<8x64xf32>
    %474 = math.absf %473 : vector<8x64xf32>
    %475 = arith.mulf %469, %472 : vector<8x64xf32>
    %476 = tpu.concatenate %469, %472, %474, %475 in 1 : vector<8x64xf32>, vector<8x64xf32>, vector<8x64xf32>, vector<8x64xf32> -> vector<8x256xf32>
    %477 = arith.truncf %476 : vector<8x256xf32> to vector<8x256xbf16>
    %c0_95 = arith.constant 0 : index
    %c0_96 = arith.constant 0 : index
    %478 = vector.load %arg5[%c0_95, %c0_96] : memref<256x128xbf16, #tpu.memory_space<vmem>>, vector<256x128xbf16>
    %cst_97 = arith.constant dense<0.000000e+00> : vector<8x128xf32>
    %479 = tpu.matmul %477, %478, %cst_97 {dimension_numbers = #tpu.dot_dimension_numbers<[1], [0], [0], [1], [0, 0, 1, 1], [], []>} : vector<8x256xbf16>, vector<256x128xbf16>, vector<8x128xf32> -> vector<8x128xf32>
    %c0_98 = arith.constant 0 : index
    %c0_99 = arith.constant 0 : index
    %480 = vector.load %arg6[%c0_98, %c0_99] : memref<1x128xf32, #tpu.memory_space<vmem>>, vector<1x128xf32>
    %481 = vector.broadcast %480 : vector<1x128xf32> to vector<8x128xf32>
    %482 = arith.addf %479, %481 : vector<8x128xf32>
    %483 = math.tanh %482 : vector<8x128xf32>
    %484 = arith.truncf %483 : vector<8x128xf32> to vector<8x128xbf16>
    %c0_100 = arith.constant 0 : index
    %c0_101 = arith.constant 0 : index
    %485 = vector.load %arg7[%c0_100, %c0_101] : memref<128x128xbf16, #tpu.memory_space<vmem>>, vector<128x128xbf16>
    %cst_102 = arith.constant dense<0.000000e+00> : vector<8x128xf32>
    %486 = tpu.matmul %484, %485, %cst_102 {dimension_numbers = #tpu.dot_dimension_numbers<[1], [0], [0], [1], [0, 0, 1, 1], [], []>} : vector<8x128xbf16>, vector<128x128xbf16>, vector<8x128xf32> -> vector<8x128xf32>
    %c0_103 = arith.constant 0 : index
    %c0_104 = arith.constant 0 : index
    %487 = vector.load %arg8[%c0_103, %c0_104] : memref<1x128xf32, #tpu.memory_space<vmem>>, vector<1x128xf32>
    %488 = vector.broadcast %487 : vector<1x128xf32> to vector<8x128xf32>
    %489 = arith.addf %486, %488 : vector<8x128xf32>
    %c0_105 = arith.constant 0 : index
    %c0_106 = arith.constant 0 : index
    %490 = vector.load %arg9[%c0_105, %c0_106] : memref<8x128xf32, #tpu.memory_space<vmem>>, vector<8x128xf32>
    tpu.vector_store %arg9[%c0_105, %c0_106], %489 {strides = array<i32>} : memref<8x128xf32, #tpu.memory_space<vmem>>, vector<8x128xf32>,
    return
  }
}

</mosaic_0001>

<bundles_post_ra>
// kernel: tpu_custom_call.1
= control target key start
LH: loop header
LB: loop body
LE: loop exit
PB: predicated region body
PF: predicated region fallthrough
CT: control target
= control target key end

     0   :  { %14 = vsyncpa [#allocation4], 0  ;;  %s3028_s0 = inlined_call_operand.vmem [shape: bf16[96,64], index: 0, kind: input, shape index: {}]   ;;  %s3029_s1 = inlined_call_operand.vmem [shape: s32[8,1], index: 1, kind: input, shape index: {}]   ;;  %s3030_s2 = inlined_call_operand.vmem [shape: bf16[64,256], index: 2, kind: input, shape index: {}]   ;;  %s3031_s3 = inlined_call_operand.hbm [shape: bf16[64,256], index: 3, kind: input, shape index: {}]   ;;  %s3032_s4 = inlined_call_operand.vmem [shape: f32[1,256], index: 4, kind: input, shape index: {}]   ;;  %s3033_s5 = inlined_call_operand.hbm [shape: bf16[256,128], index: 5, kind: input, shape index: {}]   ;;  %s3034_s6 = inlined_call_operand.vmem [shape: f32[1,128], index: 6, kind: input, shape index: {}]   ;;  %s3035_s7 = inlined_call_operand.hbm [shape: bf16[128,128], index: 7, kind: input, shape index: {}]   ;;  %s3036_s8 = inlined_call_operand.vmem [shape: f32[1,128], index: 8, kind: input, shape index: {}]   ;;  %s3037_s9 = inlined_call_operand.hbm [shape: f32[8,128], index: 9, kind: output, shape index: {}]  }
   0x1   :  { %15 = vsyncpa [#allocation7], 0 }
   0x2   :  { %16 = vsyncpa [#allocation5], 0  ;;  %s2444_s30 = smov [#allocation6]  }
   0x3   :  { %s42_s10 = sshll.u32 %s2444_s30, 4  ;;  %s43_s10 = int_to_ptr.vmem [resolvable:$true] %s42_s10 }
   0x4   :  { %s2366_s11 = scalar_lea.vmem %s43_s10, 2048  ;;  %p2371_p1 = scmp.lt.s32.totalorder %s43_s10, %s43_s10 }
   0x5   :  { %p2367_p0 = scmp.ne.s32.totalorder %s43_s10, %s2366_s11  ;;  %p2372_p2 = scmp.lt.s32.totalorder %s2366_s11, %s2366_s11 }
   0x7   :  { %p2373_p3 = por %p2372_p2, %p2371_p1 }
   0x9   :  { %p2374_p4 = pnand %p2373_p3, %p2367_p0 }
   0xb   :  { %2377 = shalt.err (!%p2374_p4)
}
   0xc   :  { %s2445_s12 = smov 64   ;;  %s2446_s13 = smov 4  }
   0xd   :  { %48 = dma.hbm_to_vmem [thread:$0]  %s3033_s5, 2048, %s43_s10, [#allocation7], %s2445_s12, %s2445_s12, %s2446_s13  }
   0xe   :  { %s2447_s16 = smov [#allocation3]  }
   0xf   :  { %s28_s17 = sshll.u32 %s2447_s16, 4  ;;  %s29_s17 = int_to_ptr.vmem [resolvable:$true] %s28_s17 }
  0x10   :  { %s2386_s18 = scalar_lea.vmem %s29_s17, 1024  ;;  %p2391_p6 = scmp.lt.s32.totalorder %s29_s17, %s29_s17 }
  0x11   :  { %p2387_p5 = scmp.ne.s32.totalorder %s29_s17, %s2386_s18  ;;  %p2392_p7 = scmp.lt.s32.totalorder %s2386_s18, %s2386_s18 }
  0x13   :  { %p2393_p8 = por %p2392_p7, %p2391_p6 }
  0x15   :  { %p2394_p9 = pnand %p2393_p8, %p2387_p5 }
  0x17   :  { %2397 = shalt.err (!%p2394_p9)
}
  0x18   :  { %s2448_s19 = smov 128   ;;  %s2449_s20 = smov 8  }
  0x19   :  { %34 = dma.hbm_to_vmem [thread:$0]  %s3031_s3, 1024, %s29_s17, [#allocation4], %s2448_s19, %s2448_s19, %s2449_s20  }
  0x1a   :  { %s2450_s23 = smov [#allocation8]  }
  0x1b   :  { %s56_s24 = sshll.u32 %s2450_s23, 4  ;;  %s57_s24 = int_to_ptr.vmem [resolvable:$true] %s56_s24 }
  0x1c   :  { %s2406_s5 = scalar_lea.vmem %s57_s24, 1024  ;;  %p2411_p11 = scmp.lt.s32.totalorder %s57_s24, %s57_s24 }
  0x1d   :  { %p2407_p10 = scmp.ne.s32.totalorder %s57_s24, %s2406_s5  ;;  %p2412_p12 = scmp.lt.s32.totalorder %s2406_s5, %s2406_s5 }
  0x1f   :  { %p2413_p13 = por %p2412_p12, %p2411_p11 }
  0x21   :  { %p2414_p0 = pnand %p2413_p13, %p2407_p10 }
  0x23   :  { %2417 = shalt.err (!%p2414_p0)
}
  0x24   :  { %62 = dma.hbm_to_vmem [thread:$0]  %s3035_s7, 1024, %s57_s24, [#allocation7], %s2445_s12, %s2445_s12, %s2446_s13  }
  0x25   :  { %2438 = dma.done.wait [#allocation4], 1024  }
  0x26   :  { %2439 = vsyncadd [#allocation4], 4294966272 }
  0x27   :  { %2440 = dma.done.wait [#allocation7], 3072  }
  0x28   :  { %2441 = vsyncadd [#allocation7], 4294964224  ;;  %v2451_v0 = vmov 0   ;;  %v2149_v1 = vld [vmem:[%s3030_s2 + $0x34] ss:$8 sps:$4 sm:$0xff]   ;;  %v2161_v11 = vld [vmem:[%s3028_s0] sm:$0xff]   ;;  %v372_v23 = vlaneseq }
  0x29   :  { %216 = vmatprep.mubr.bf16.mxu0 %v2451_v0  ;;  %499 = vmatprep.mubr.bf16.mxu1 %v2451_v0  ;;  %v2151_v2 = vld [vmem:[%s3030_s2 + $0x30] ss:$8 sps:$4 sm:$0xff]   ;;  %v2152_v3 = vld [vmem:[%s3030_s2 + $0x24] ss:$8 sps:$4 sm:$0xff]   ;;  %v2154_v4 = vld [vmem:[%s3030_s2 + $0x20] ss:$8 sps:$4 sm:$0xff]  }
  0x2a   :  { %2142 = vset.pattern.permute.xlu1 %v2451_v0  ;;  %2143 = vset.pattern.permute.xlu0 %v2451_v0  ;;  %v2155_v5 = vld [vmem:[%s3030_s2 + $0x14] ss:$8 sps:$4 sm:$0xff]   ;;  %v2157_v6 = vld [vmem:[%s3030_s2 + $0x10] ss:$8 sps:$4 sm:$0xff]   ;;  %v2158_v7 = vld [vmem:[%s3030_s2 + $0x4] ss:$8 sps:$4 sm:$0xff]  }
  0x2b   :  { %192 = vmatprep.subr.bf16.mxu0 %v2149_v1  ;;  %v2554_v8 = vld [vmem:[#allocation3 + $0x34] ss:$8 sps:$4 sm:$0xff]   ;;  %v2556_v9 = vld [vmem:[#allocation3 + $0x30] ss:$8 sps:$4 sm:$0xff]   ;;  %v2160_v10 = vld [vmem:[%s3030_s2] ss:$8 sps:$4 sm:$0xff]  }
  0x2c   :  { %193 = vmatpush1.bf16.msra.mxu0 %v2151_v2  ;;  %475 = vmatprep.subr.bf16.mxu1 %v2554_v8  ;;  %v2565_v12 = vld [vmem:[#allocation3 + $0x24] ss:$8 sps:$4 sm:$0xff]   ;;  %v2568_v13 = vld [vmem:[#allocation3 + $0x20] ss:$8 sps:$4 sm:$0xff]   ;;  %v2571_v14 = vld [vmem:[#allocation3 + $0x14] ss:$8 sps:$4 sm:$0xff]  }
  0x2d   :  { %194 = vmatprep.subr.bf16.mxu0 %v2152_v3  ;;  %476 = vmatpush1.bf16.msra.mxu1 %v2556_v9  ;;  %vm165_vm0 = vcmask 523264   ;;  %v2573_v15 = vld [vmem:[#allocation3 + $0x10] ss:$8 sps:$4 sm:$0xff]   ;;  %v2575_v16 = vld [vmem:[#allocation3 + $0x4] ss:$8 sps:$4 sm:$0xff]   ;;  %v373_v24 = vshrl.u32 %v372_v23, 7 }
  0x2e   :  { %477 = vmatprep.subr.bf16.mxu1 %v2565_v12  ;;  %v2582_v17 = vld [vmem:[#allocation3] ss:$8 sps:$4 sm:$0xff]   ;;  %v2163_v19 = vld [vmem:[%s3028_s0 + $0x10] sm:$0xff]   ;;  %v2164_v20 = vld [vmem:[%s3028_s0 + $0x18] sm:$0xff]   ;;  %v2646_v37 = vand.u32 127, %v372_v23  ;;  %s2465_s15 = smov [#allocation9]  }
  0x2f   :  { %v2162_v18 = vld [vmem:[%s3028_s0 + $0x8] sm:$0xff]   ;;  %v2168_v21 = vld [vmem:[%s3028_s0 + $0x20] sm:$0xff]   ;;  %v374_v25 = vsub.s32 0, %v373_v24  ;;  %v378_v54 = vsub.s32 1, %v373_v24  ;;  %s1946_s16 = sshll.u32 %s2465_s15, 4  ;;  %s1947_s16 = int_to_ptr.vmem [resolvable:$true] %s1946_s16 }
  0x30   :  { %195 = vmatpush1.bf16.msra.mxu0 %v2154_v4  ;;  %v2175_v22 = vld [vmem:[%s3028_s0 + $0x28] sm:$0xff]   ;;  %v370_v26 = vld [vmem:[%s3032_s4] sm:$0x3]  ;;  %v385_v43 = vadd.s32 128, %v2646_v37  ;;  %v390_v48 = vand.u32 63, %v2646_v37  ;;  %vm384_vm4 = vcmp.lt.s32.totalorder %v2646_v37, 32  ;;  %p2423_p2 = scmp.lt.s32.totalorder %s1947_s16, %s1947_s16 }
  0x31   :  { %196 = vmatprep.subr.bf16.mxu0 %v2155_v5  ;;  %478 = vmatpush1.bf16.msra.mxu1 %v2568_v13  ;;  %v2634_v27 = vrot.slane %v370_v26, %v374_v25  ;;  %v2656_v59 = vrot.slane %v370_v26, %v378_v54  ;;  %v361_v56 = vld [vmem:[%s3029_s1] sm:$0xff] }
  0x32   :  { %479 = vmatprep.subr.bf16.mxu1 %v2571_v14  ;;  %v397_v49 = vand.u32 63, %v385_v43  ;;  %vm410_vm1 = vcmp.lt.s32.totalorder %v390_v48, 32  ;;  %542 = vperm.xlu1 %2142, %v361_v56  }
  0x34   :  { %197 = vmatpush1.bf16.msra.mxu0 %v2157_v6  ;;  %vm411_vm2 = vcmp.lt.s32.totalorder %v397_v49, 32 }
  0x35   :  { %198 = vmatprep.subr.bf16.mxu0 %v2158_v7  ;;  %480 = vmatpush1.bf16.msra.mxu1 %v2573_v15  ;;  %vm2652_vm3 = vmpackc.low %vm411_vm2, %vm410_vm1 }
  0x36   :  { %481 = vmatprep.subr.bf16.mxu1 %v2575_v16 }
  0x38   :  { %199 = vmatpush1.bf16.msra.mxu0 %v2160_v10 }
  0x39   :  { %771 = vmatprep.subr.bf16.mxu0 %v2554_v8  ;;  %482 = vmatpush1.bf16.msra.mxu1 %v2582_v17 }
  0x3a   :  { %573 = vmatprep.subr.bf16.mxu1 %v2554_v8 }
  0x3b   :  { %1970 = vmatmul.mubr.msk.bf16.vlgmr.msra.gmra.mxu0 %vm165_vm0, %v2161_v11 }
  0x3c   :  { %226 = vmatprep.mubr.bf16.mxu0 %v2451_v0  ;;  %772 = vmatpush1.bf16.msra.mxu0 %v2556_v9 }
  0x3d   :  { %773 = vmatprep.subr.bf16.mxu0 %v2565_v12  ;;  %500 = vmatmul.mubr.bf16.vlgmr.msra.gmra.mxu1 %v2451_v0 }
  0x3e   :  { %574 = vmatpush1.bf16.msra.mxu1 %v2556_v9  ;;  %597 = vmatprep.mubr.bf16.mxu1 %v2451_v0 }
  0x3f   :  { %575 = vmatprep.subr.bf16.mxu1 %v2565_v12 }
  0x40   :  { %774 = vmatpush1.bf16.msra.mxu0 %v2568_v13 }
  0x41   :  { %775 = vmatprep.subr.bf16.mxu0 %v2571_v14 }
  0x42   :  { %576 = vmatpush1.bf16.msra.mxu1 %v2568_v13 }
  0x43   :  { %1971 = vmatmul.mubr.msk.bf16.gmra.mxu0 %vm165_vm0, %v2162_v18  ;;  %577 = vmatprep.subr.bf16.mxu1 %v2571_v14 }
  0x44   :  { %236 = vmatprep.mubr.bf16.mxu0 %v2451_v0  ;;  %776 = vmatpush1.bf16.msra.mxu0 %v2573_v15 }
  0x45   :  { %777 = vmatprep.subr.bf16.mxu0 %v2575_v16 }
  0x46   :  { %578 = vmatpush1.bf16.msra.mxu1 %v2573_v15 }
  0x47   :  { %579 = vmatprep.subr.bf16.mxu1 %v2575_v16 }
  0x48   :  { %778 = vmatpush1.bf16.msra.mxu0 %v2582_v17 }
  0x49   :  { %969 = vmatprep.subr.bf16.mxu0 %v2554_v8 }
  0x4a   :  { %580 = vmatpush1.bf16.msra.mxu1 %v2582_v17 }
  0x4b   :  { %1972 = vmatmul.mubr.msk.bf16.gmra.mxu0 %vm165_vm0, %v2163_v19  ;;  %672 = vmatprep.subr.bf16.mxu1 %v2554_v8 }
  0x4c   :  { %246 = vmatprep.mubr.bf16.mxu0 %v2451_v0 }
  0x53   :  { %1973 = vmatmul.mubr.msk.bf16.gmra.mxu0 %vm165_vm0, %v2164_v20 }
  0x54   :  { %256 = vmatprep.mubr.bf16.mxu0 %v2451_v0 }
  0x5b   :  { %1974 = vmatmul.mubr.msk.bf16.gmra.mxu0 %vm165_vm0, %v2168_v21 }
  0x5c   :  { %266 = vmatprep.mubr.bf16.mxu0 %v2451_v0 }
  0x63   :  { %1975 = vmatmul.mubr.msk.bf16.gmra.mxu0 %vm165_vm0, %v2175_v22 }
  0x64   :  { %795 = vmatprep.mubr.bf16.mxu0 %v2451_v0 }
  0xfb   :  { %v2636_v28 = vpop.f32.mrf.mxu0 }
  0xfd   :  { %v2638_v29 = vpop.f32.mrf.mxu0  ;;  %v2642_v35 = vpop.f32.mrf.mxu1 }
  0xff   :  { %v222_v30 = vpop.f32.mrf.mxu0  ;;  %v2648_v39 = vpop.f32.mrf.mxu1 }
 0x101   :  { %v224_v31 = vpop.f32.mrf.mxu0  ;;  %v505_v41 = vpop.f32.mrf.mxu1 }
 0x102   :  { %v2640_v32 = vpack.c.bf16 %v224_v31, %v222_v30 }
 0x103   :  { %v228_v33 = vpop.f32.mrf.mxu0  ;;  %v506_v45 = vpop.f32.mrf.mxu1 }
 0x105   :  { %v230_v34 = vpop.f32.mrf.mxu0 }
 0x106   :  { %v2644_v36 = vpack.c.bf16 %v230_v34, %v228_v33 }
 0x107   :  { %v232_v38 = vpop.f32.mrf.mxu0 }
 0x109   :  { %v234_v40 = vpop.f32.mrf.mxu0 }
 0x10a   :  { %v2060_v42 = vpack.c.bf16 %v234_v40, %v232_v38 }
 0x10b   :  { %v238_v44 = vpop.f32.mrf.mxu0 }
 0x10d   :  { %v240_v46 = vpop.f32.mrf.mxu0 }
 0x10e   :  { %v2061_v47 = vpack.c.bf16 %v240_v46, %v238_v44 }
 0x10f   :  { %v242_v50 = vpop.f32.mrf.mxu0 }
 0x111   :  { %v244_v51 = vpop.f32.mrf.mxu0 }
 0x112   :  { %v2062_v52 = vpack.c.bf16 %v244_v51, %v242_v50 }
 0x113   :  { %v248_v53 = vpop.f32.mrf.mxu0 }
 0x115   :  { %v250_v55 = vpop.f32.mrf.mxu0 }
 0x116   :  { %v2063_v57 = vpack.c.bf16 %v250_v55, %v248_v53 }
 0x117   :  { %v252_v58 = vpop.f32.mrf.mxu0 }
 0x118   :  { %v953_v60 = vsel %vm2652_vm3, %v2062_v52, %v2063_v57  ;;  %v1050_v61 = vsel %vm2652_vm3, %v2063_v57, %v2062_v52 }
 0x119   :  { %v254_v62 = vpop.f32.mrf.mxu0  ;;  %v954_v63 = vunpack.c.l.bf16 %v953_v60  ;;  %v955_v1 = vunpack.c.h.bf16 %v953_v60  ;;  %v1051_v2 = vunpack.c.l.bf16 %v1050_v61  ;;  %v1052_v3 = vunpack.c.h.bf16 %v1050_v61 }
 0x11a   :  { %v2064_v4 = vpack.c.bf16 %v254_v62, %v252_v58 }
 0x11b   :  { %v258_v5 = vpop.f32.mrf.mxu0  ;;  %v2663_v6 = vadd.f32 %v954_v63, %v2634_v27  ;;  %v2666_v7 = vadd.f32 %v955_v1, %v2656_v59  ;;  %v2669_v10 = vadd.f32 %v1051_v2, %v2634_v27  ;;  %v2672_v11 = vadd.f32 %v1052_v3, %v2656_v59 }
 0x11c   :  { %v854_v18 = vsel %vm2652_vm3, %v2061_v47, %v2064_v4  ;;  %v1147_v19 = vsel %vm2652_vm3, %v2064_v4, %v2061_v47 }
 0x11d   :  { %v260_v20 = vpop.f32.mrf.mxu0  ;;  %v855_v21 = vunpack.c.l.bf16 %v854_v18  ;;  %v856_v22 = vunpack.c.h.bf16 %v854_v18  ;;  %v1148_v23 = vunpack.c.l.bf16 %v1147_v19  ;;  %v1149_v24 = vunpack.c.h.bf16 %v1147_v19 }
 0x11e   :  { %v2065_v25 = vpack.c.bf16 %v260_v20, %v258_v5 }
 0x11f   :  { %v262_v26 = vpop.f32.mrf.mxu0  ;;  %v2679_v30 = vadd.f32 %v855_v21, %v2634_v27  ;;  %v2682_v31 = vadd.f32 %v856_v22, %v2656_v59  ;;  %v2685_v33 = vadd.f32 %v1148_v23, %v2634_v27  ;;  %v2688_v34 = vadd.f32 %v1149_v24, %v2656_v59 }
 0x120   :  { %v755_v38 = vsel %vm2652_vm3, %v2060_v42, %v2065_v25  ;;  %v1244_v40 = vsel %vm2652_vm3, %v2065_v25, %v2060_v42  ;;  %v2057_v22 = vpack.c.bf16 %v2638_v29, %v2636_v28 }
 0x121   :  { %v264_v41 = vpop.f32.mrf.mxu0  ;;  %v756_v43 = vunpack.c.l.bf16 %v755_v38  ;;  %v757_v44 = vunpack.c.h.bf16 %v755_v38  ;;  %v1245_v45 = vunpack.c.l.bf16 %v1244_v40  ;;  %v1246_v46 = vunpack.c.h.bf16 %v1244_v40 }
 0x122   :  { %v2066_v47 = vpack.c.bf16 %v264_v41, %v262_v26 }
 0x123   :  { %v268_v48 = vpop.f32.mrf.mxu0  ;;  %v2695_v49 = vadd.f32 %v756_v43, %v2634_v27  ;;  %v2698_v50 = vadd.f32 %v757_v44, %v2656_v59  ;;  %v2701_v51 = vadd.f32 %v1245_v45, %v2634_v27  ;;  %v2704_v52 = vadd.f32 %v1246_v46, %v2656_v59 }
 0x124   :  { %v656_v42 = vsel %vm2652_vm3, %v2644_v36, %v2066_v47  ;;  %v1341_v53 = vsel %vm2652_vm3, %v2066_v47, %v2644_v36 }
 0x125   :  { %v270_v54 = vpop.f32.mrf.mxu0  ;;  %v657_v55 = vunpack.c.l.bf16 %v656_v42  ;;  %v658_v57 = vunpack.c.h.bf16 %v656_v42  ;;  %v1342_v58 = vunpack.c.l.bf16 %v1341_v53  ;;  %v1343_v60 = vunpack.c.h.bf16 %v1341_v53 }
 0x126   :  { %v2067_v61 = vpack.c.bf16 %v270_v54, %v268_v48 }
 0x127   :  { %v272_v62 = vpop.f32.mrf.mxu0  ;;  %v2713_v63 = vadd.f32 %v657_v55, %v2634_v27  ;;  %v2716_v1 = vadd.f32 %v658_v57, %v2656_v59  ;;  %v2719_v2 = vadd.f32 %v1342_v58, %v2634_v27  ;;  %v2722_v3 = vadd.f32 %v1343_v60, %v2656_v59 }
 0x128   :  { %v557_v36 = vsel %vm2652_vm3, %v2640_v32, %v2067_v61  ;;  %v1438_v4 = vsel %vm2652_vm3, %v2067_v61, %v2640_v32 }
 0x129   :  { %v274_v5 = vpop.f32.mrf.mxu0  ;;  %v558_v18 = vunpack.c.l.bf16 %v557_v36  ;;  %v559_v19 = vunpack.c.h.bf16 %v557_v36  ;;  %v1439_v20 = vunpack.c.l.bf16 %v1438_v4  ;;  %v1440_v21 = vunpack.c.h.bf16 %v1438_v4  ;;  %v2766_v4 = vpop.permute.xlu1 %542 }
 0x12a   :  { %v2068_v23 = vpack.c.bf16 %v274_v5, %v272_v62  ;;  %v2452_v5 = vmov 11  }
 0x12b   :  { %v2733_v24 = vadd.f32 %v558_v18, %v2634_v27  ;;  %v2736_v25 = vadd.f32 %v559_v19, %v2656_v59  ;;  %v2739_v26 = vadd.f32 %v1439_v20, %v2634_v27  ;;  %v2742_v32 = vadd.f32 %v1440_v21, %v2656_v59 }
 0x12c   :  { %v419_v38 = vsel %vm2652_vm3, %v2057_v22, %v2068_v23  ;;  %v1535_v40 = vsel %vm2652_vm3, %v2068_v23, %v2057_v22  ;;  %v2770_v18 = vsel %vm384_vm4, 0, %v2452_v5 }
 0x12d   :  { %v420_v28 = vunpack.c.l.bf16 %v419_v38  ;;  %v421_v29 = vunpack.c.h.bf16 %v419_v38  ;;  %v1536_v41 = vunpack.c.l.bf16 %v1535_v40  ;;  %v1537_v43 = vunpack.c.h.bf16 %v1535_v40 }
 0x12e   :  { %vm544_vm5 = vcmp.gt.s32.totalorder %v2766_v4, %v2770_v18 }
 0x12f   :  { %v422_v44 = vadd.f32 %v420_v28, %v2634_v27  ;;  %v423_v45 = vadd.f32 %v421_v29, %v2656_v59  ;;  %v2751_v46 = vadd.f32 %v1536_v41, %v2634_v27  ;;  %v2754_v47 = vadd.f32 %v1537_v43, %v2656_v59  ;;  %vm546_vm6 = vmpackc.low %vm544_vm5, %vm544_vm5 }
 0x131   :  { %v508_v48 = vadd.f32 %v2642_v35, %v422_v44  ;;  %v509_v42 = vadd.f32 %v2648_v39, %v423_v45 }
 0x133   :  { %2203 = vtanh.f32 %v509_v42  ;;  %v1996_v54 = vmul.f32 -1.442695, %v508_v48  ;;  %v1997_v62 = vmul.f32 -1.442695, %v509_v42 }
 0x135   :  { %2205 = vpow2.f32 %v1996_v54 }
 0x140   :  { %v2204_v53 = vpop.eup %2203 }
 0x141   :  { %525 = vrot.lane.b32.xlu0 %v2204_v53, %s2445_s12 }
 0x142   :  { %v2206_v27 = vpop.eup %2205 }
 0x143   :  { %v516_v55 = vadd.f32 1.0, %v2206_v27 }
 0x145   :  { %2207 = vrcp.f32 %v516_v55 }
 0x152   :  { %v2208_v59 = vpop.eup %2207 }
 0x153   :  { %v523_v35 = vmul.f32 0.0, %v2208_v59 }
 0x1b3   :  { %v526_v57 = vpop.permute.xlu0 %525 }
 0x1b4   :  { %v528_v58 = vmul.f32 %v2208_v59, %v526_v57 }
 0x1b6   :  { %530 = vrot.lane.b32.xlu0 %v528_v58, %s2445_s12 }
 0x228   :  { %v531_v39 = vpop.permute.xlu0 %530 }
 0x229   :  { %v533_v60 = vadd.f32 %v531_v39, %v523_v35 }
 0x22b   :  { %2209 = vtanh.f32 %v533_v60  ;;  %549 = vrot.lane.b32.xlu0 %v533_v60, %s2445_s12 }
 0x22c   :  { %2211 = vpow2.f32 %v1997_v62  ;;  %v2453_v62 = vmov 10  }
 0x238   :  { %v2210_v61 = vpop.eup %2209 }
 0x239   :  { %536 = vrot.lane.b32.xlu1 %v2210_v61, %s2445_s12  ;;  %v2212_v36 = vpop.eup %2211 }
 0x23a   :  { %v517_v19 = vadd.f32 1.0, %v2212_v36  ;;  %v642_v36 = vsel %vm384_vm4, 1, %v2453_v62 }
 0x23b   :  { %vm643_vm7 = vcmp.gt.s32.totalorder %v2766_v4, %v642_v36 }
 0x23c   :  { %2213 = vrcp.f32 %v517_v19  ;;  %vm645_vm8 = vmpackc.low %vm643_vm7, %vm643_vm7 }
 0x249   :  { %v2214_v22 = vpop.eup %2213 }
 0x29d   :  { %v550_v20 = vpop.permute.xlu0 %549 }
 0x29e   :  { %v552_v21 = vsel %vm544_vm5, %v550_v20, 0.0 }
 0x29f   :  { %622 = vrot.lane.b32.xlu0 %v552_v21, %s2445_s12 }
 0x2ab   :  { %v537_v23 = vpop.permute.xlu1 %536 }
 0x2ac   :  { %v539_v38 = vmul.f32 %v2214_v22, %v537_v23 }
 0x2ae   :  { %v545_v40 = vpack.c.bf16 %v539_v38, %v539_v38  ;;  %v553_v20 = vmax.f32 %v539_v38, -1e+09 }
 0x2b0   :  { %v547_v28 = vsel %vm546_vm6, %v545_v40, 0 }
 0x2b1   :  { %1998 = vmatmul.mubr.msk.bf16.vlgmr.msra.gmra.mxu1 %vm165_vm0, %v547_v28 }
 0x2b2   :  { %673 = vmatpush1.bf16.msra.mxu1 %v2556_v9  ;;  %696 = vmatprep.mubr.bf16.mxu1 %v2451_v0 }
 0x2b3   :  { %674 = vmatprep.subr.bf16.mxu1 %v2565_v12 }
 0x2b6   :  { %675 = vmatpush1.bf16.msra.mxu1 %v2568_v13 }
 0x2b7   :  { %676 = vmatprep.subr.bf16.mxu1 %v2571_v14 }
 0x2ba   :  { %677 = vmatpush1.bf16.msra.mxu1 %v2573_v15 }
 0x2bb   :  { %678 = vmatprep.subr.bf16.mxu1 %v2575_v16 }
 0x2be   :  { %679 = vmatpush1.bf16.msra.mxu1 %v2582_v17 }
 0x2bf   :  { %870 = vmatprep.subr.bf16.mxu1 %v2554_v8 }
 0x371   :  { %v599_v29 = vpop.f32.mrf.mxu1 }
 0x372   :  { %v606_v41 = vadd.f32 %v599_v29, %v2733_v24  ;;  %v623_v24 = vpop.permute.xlu0 %622  ;;  %v554_v29 = vsel %vm544_vm5, %v553_v20, -1e+09 }
 0x373   :  { %v601_v43 = vpop.f32.mrf.mxu1 }
 0x374   :  { %v607_v44 = vadd.f32 %v601_v43, %v2736_v25  ;;  %v1999_v56 = vmul.f32 -1.442695, %v606_v41 }
 0x375   :  { %v603_v45 = vpop.f32.mrf.mxu1 }
 0x376   :  { %2215 = vtanh.f32 %v607_v44  ;;  %v2000_v39 = vmul.f32 -1.442695, %v607_v44 }
 0x377   :  { %v604_v48 = vpop.f32.mrf.mxu1  ;;  %2217 = vpow2.f32 %v1999_v56 }
 0x383   :  { %v2216_v42 = vpop.eup %2215 }
 0x384   :  { %627 = vrot.lane.b32.xlu1 %v2216_v42, %s2445_s12  ;;  %v2218_v53 = vpop.eup %2217 }
 0x385   :  { %v614_v54 = vadd.f32 1.0, %v2218_v53 }
 0x387   :  { %2219 = vrcp.f32 %v614_v54 }
 0x394   :  { %v2220_v27 = vpop.eup %2219 }
 0x395   :  { %v625_v57 = vmul.f32 %v2220_v27, %v623_v24 }
 0x3f6   :  { %v628_v55 = vpop.permute.xlu1 %627 }
 0x3f7   :  { %v630_v59 = vmul.f32 %v2220_v27, %v628_v55 }
 0x3f9   :  { %632 = vrot.lane.b32.xlu1 %v630_v59, %s2445_s12 }
 0x46b   :  { %v633_v58 = vpop.permute.xlu1 %632 }
 0x46c   :  { %v635_v25 = vadd.f32 %v633_v58, %v625_v57 }
 0x46e   :  { %2221 = vtanh.f32 %v635_v25  ;;  %648 = vrot.lane.b32.xlu1 %v635_v25, %s2445_s12 }
 0x46f   :  { %2223 = vpow2.f32 %v2000_v39 }
 0x47b   :  { %v2222_v35 = vpop.eup %2221 }
 0x47c   :  { %638 = vrot.lane.b32.xlu0 %v2222_v35, %s2445_s12  ;;  %v2224_v60 = vpop.eup %2223 }
 0x47d   :  { %v615_v61 = vadd.f32 1.0, %v2224_v60 }
 0x47f   :  { %2225 = vrcp.f32 %v615_v61  ;;  %v2454_v61 = vmov 9  }
 0x480   :  { %v741_v62 = vsel %vm384_vm4, 2, %v2454_v61 }
 0x481   :  { %vm742_vm9 = vcmp.gt.s32.totalorder %v2766_v4, %v741_v62 }
 0x482   :  { %vm744_vm10 = vmpackc.low %vm742_vm9, %vm742_vm9 }
 0x48c   :  { %v2226_v22 = vpop.eup %2225 }
 0x4e0   :  { %v649_v5 = vpop.permute.xlu1 %648 }
 0x4e1   :  { %v651_v19 = vsel %vm643_vm7, %v649_v5, %v552_v21 }
 0x4e2   :  { %721 = vrot.lane.b32.xlu1 %v651_v19, %s2445_s12 }
 0x4ee   :  { %v639_v23 = vpop.permute.xlu0 %638 }
 0x4ef   :  { %v641_v40 = vmul.f32 %v2226_v22, %v639_v23 }
 0x4f1   :  { %v644_v41 = vpack.c.bf16 %v641_v40, %v641_v40  ;;  %v652_v43 = vmax.f32 %v554_v29, %v641_v40 }
 0x4f3   :  { %v646_v44 = vsel %vm645_vm8, %v644_v41, %v547_v28  ;;  %v653_v45 = vsel %vm643_vm7, %v652_v43, %v554_v29 }
 0x4f4   :  { %2001 = vmatmul.mubr.msk.bf16.vlgmr.msra.gmra.mxu1 %vm165_vm0, %v646_v44 }
 0x4f5   :  { %871 = vmatpush1.bf16.msra.mxu1 %v2556_v9  ;;  %894 = vmatprep.mubr.bf16.mxu1 %v2451_v0 }
 0x4f6   :  { %872 = vmatprep.subr.bf16.mxu1 %v2565_v12 }
 0x4f9   :  { %873 = vmatpush1.bf16.msra.mxu1 %v2568_v13 }
 0x4fa   :  { %874 = vmatprep.subr.bf16.mxu1 %v2571_v14 }
 0x4fd   :  { %875 = vmatpush1.bf16.msra.mxu1 %v2573_v15 }
 0x4fe   :  { %876 = vmatprep.subr.bf16.mxu1 %v2575_v16 }
 0x501   :  { %877 = vmatpush1.bf16.msra.mxu1 %v2582_v17 }
 0x502   :  { %1066 = vmatprep.subr.bf16.mxu1 %v2554_v8 }
 0x5b4   :  { %v698_v18 = vpop.f32.mrf.mxu1 }
 0x5b5   :  { %v705_v21 = vadd.f32 %v698_v18, %v2713_v63  ;;  %v722_v63 = vpop.permute.xlu1 %721 }
 0x5b6   :  { %v700_v38 = vpop.f32.mrf.mxu1 }
 0x5b7   :  { %v706_v28 = vadd.f32 %v700_v38, %v2716_v1  ;;  %v2002_v53 = vmul.f32 -1.442695, %v705_v21 }
 0x5b8   :  { %v702_v48 = vpop.f32.mrf.mxu1 }
 0x5b9   :  { %2227 = vtanh.f32 %v706_v28  ;;  %v2003_v35 = vmul.f32 -1.442695, %v706_v28 }
 0x5ba   :  { %v703_v42 = vpop.f32.mrf.mxu1  ;;  %2229 = vpow2.f32 %v2002_v53 }
 0x5c6   :  { %v2228_v56 = vpop.eup %2227 }
 0x5c7   :  { %726 = vrot.lane.b32.xlu0 %v2228_v56, %s2445_s12  ;;  %v2230_v54 = vpop.eup %2229 }
 0x5c8   :  { %v713_v27 = vadd.f32 1.0, %v2230_v54 }
 0x5ca   :  { %2231 = vrcp.f32 %v713_v27 }
 0x5d7   :  { %v2232_v55 = vpop.eup %2231 }
 0x5d8   :  { %v724_v57 = vmul.f32 %v2232_v55, %v722_v63 }
 0x639   :  { %v727_v59 = vpop.permute.xlu0 %726 }
 0x63a   :  { %v729_v24 = vmul.f32 %v2232_v55, %v727_v59 }
 0x63c   :  { %731 = vrot.lane.b32.xlu0 %v729_v24, %s2445_s12 }
 0x6ae   :  { %v732_v58 = vpop.permute.xlu0 %731 }
 0x6af   :  { %v734_v1 = vadd.f32 %v732_v58, %v724_v57 }
 0x6b1   :  { %2233 = vtanh.f32 %v734_v1  ;;  %747 = vrot.lane.b32.xlu0 %v734_v1, %s2445_s12  ;;  %v2455_v1 = vmov 8  }
 0x6b2   :  { %2235 = vpow2.f32 %v2003_v35 }
 0x6be   :  { %v2234_v25 = vpop.eup %2233 }
 0x6bf   :  { %737 = vrot.lane.b32.xlu1 %v2234_v25, %s2445_s12  ;;  %v2236_v39 = vpop.eup %2235  ;;  %v840_v25 = vsel %vm384_vm4, 3, %v2455_v1 }
 0x6c0   :  { %v714_v60 = vadd.f32 1.0, %v2236_v39  ;;  %vm841_vm11 = vcmp.gt.s32.totalorder %v2766_v4, %v840_v25 }
 0x6c1   :  { %vm843_vm12 = vmpackc.low %vm841_vm11, %vm841_vm11 }
 0x6c2   :  { %2237 = vrcp.f32 %v714_v60 }
 0x6cf   :  { %v2238_v20 = vpop.eup %2237 }
 0x723   :  { %v748_v36 = vpop.permute.xlu0 %747 }
 0x724   :  { %v750_v5 = vsel %vm742_vm9, %v748_v36, %v651_v19 }
 0x725   :  { %820 = vrot.lane.b32.xlu0 %v750_v5, %s2445_s12 }
 0x731   :  { %v738_v22 = vpop.permute.xlu1 %737 }
 0x732   :  { %v740_v23 = vmul.f32 %v2238_v20, %v738_v22 }
 0x734   :  { %v743_v40 = vpack.c.bf16 %v740_v23, %v740_v23  ;;  %v751_v29 = vmax.f32 %v653_v45, %v740_v23 }
 0x736   :  { %v745_v41 = vsel %vm744_vm10, %v743_v40, %v646_v44  ;;  %v752_v43 = vsel %vm742_vm9, %v751_v29, %v653_v45 }
 0x737   :  { %2004 = vmatmul.mubr.msk.bf16.vlgmr.msra.gmra.mxu0 %vm165_vm0, %v745_v41 }
 0x738   :  { %970 = vmatpush1.bf16.msra.mxu0 %v2556_v9  ;;  %993 = vmatprep.mubr.bf16.mxu0 %v2451_v0 }
 0x739   :  { %971 = vmatprep.subr.bf16.mxu0 %v2565_v12 }
 0x73c   :  { %972 = vmatpush1.bf16.msra.mxu0 %v2568_v13 }
 0x73d   :  { %973 = vmatprep.subr.bf16.mxu0 %v2571_v14 }
 0x740   :  { %974 = vmatpush1.bf16.msra.mxu0 %v2573_v15 }
 0x741   :  { %975 = vmatprep.subr.bf16.mxu0 %v2575_v16 }
 0x744   :  { %976 = vmatpush1.bf16.msra.mxu0 %v2582_v17 }
 0x745   :  { %1163 = vmatprep.subr.bf16.mxu0 %v2554_v8 }
 0x7f7   :  { %v797_v19 = vpop.f32.mrf.mxu0 }
 0x7f8   :  { %v804_v44 = vadd.f32 %v797_v19, %v2695_v49  ;;  %v821_v49 = vpop.permute.xlu0 %820 }
 0x7f9   :  { %v799_v45 = vpop.f32.mrf.mxu0 }
 0x7fa   :  { %v805_v18 = vadd.f32 %v799_v45, %v2698_v50  ;;  %v2005_v48 = vmul.f32 -1.442695, %v804_v44 }
 0x7fb   :  { %v801_v21 = vpop.f32.mrf.mxu0 }
 0x7fc   :  { %2239 = vtanh.f32 %v805_v18  ;;  %v2006_v63 = vmul.f32 -1.442695, %v805_v18 }
 0x7fd   :  { %v802_v38 = vpop.f32.mrf.mxu0  ;;  %2241 = vpow2.f32 %v2005_v48 }
 0x809   :  { %v2240_v28 = vpop.eup %2239 }
 0x80a   :  { %825 = vrot.lane.b32.xlu1 %v2240_v28, %s2445_s12  ;;  %v2242_v42 = vpop.eup %2241 }
 0x80b   :  { %v812_v56 = vadd.f32 1.0, %v2242_v42 }
 0x80d   :  { %2243 = vrcp.f32 %v812_v56 }
 0x81a   :  { %v2244_v53 = vpop.eup %2243 }
 0x81b   :  { %v823_v55 = vmul.f32 %v2244_v53, %v821_v49 }
 0x87c   :  { %v826_v54 = vpop.permute.xlu1 %825 }
 0x87d   :  { %v828_v27 = vmul.f32 %v2244_v53, %v826_v54 }
 0x87f   :  { %830 = vrot.lane.b32.xlu1 %v828_v27, %s2445_s12 }
 0x8f1   :  { %v831_v59 = vpop.permute.xlu1 %830 }
 0x8f2   :  { %v833_v50 = vadd.f32 %v831_v59, %v823_v55  ;;  %v2456_v55 = vmov 7  }
 0x8f3   :  { %v939_v59 = vsel %vm384_vm4, 4, %v2456_v55  ;;  %v2913_v55 = vld [vmem:[#allocation3] ss:$8 sps:$4 sm:$0xff]  }
 0x8f4   :  { %2245 = vtanh.f32 %v833_v50  ;;  %846 = vrot.lane.b32.xlu1 %v833_v50, %s2445_s12  ;;  %vm940_vm13 = vcmp.gt.s32.totalorder %v2766_v4, %v939_v59  ;;  %v2356_v59 = vld [vmem:[#allocation3 + $0x34] ss:$8 sps:$4 sm:$0xff]  }
 0x8f5   :  { %2247 = vpow2.f32 %v2006_v63  ;;  %vm942_vm14 = vmpackc.low %vm940_vm13, %vm940_vm13 }
 0x901   :  { %v2246_v24 = vpop.eup %2245 }
 0x902   :  { %836 = vrot.lane.b32.xlu0 %v2246_v24, %s2445_s12  ;;  %v2248_v57 = vpop.eup %2247 }
 0x903   :  { %v813_v58 = vadd.f32 1.0, %v2248_v57 }
 0x905   :  { %2249 = vrcp.f32 %v813_v58 }
 0x912   :  { %v2250_v60 = vpop.eup %2249 }
 0x966   :  { %v847_v35 = vpop.permute.xlu1 %846 }
 0x967   :  { %v849_v39 = vsel %vm841_vm11, %v847_v35, %v750_v5 }
 0x968   :  { %919 = vrot.lane.b32.xlu1 %v849_v39, %s2445_s12 }
 0x974   :  { %v837_v61 = vpop.permute.xlu0 %836 }
 0x975   :  { %v839_v62 = vmul.f32 %v2250_v60, %v837_v61 }
 0x977   :  { %v842_v36 = vpack.c.bf16 %v839_v62, %v839_v62  ;;  %v850_v20 = vmax.f32 %v752_v43, %v839_v62 }
 0x979   :  { %v844_v22 = vsel %vm843_vm12, %v842_v36, %v745_v41  ;;  %v851_v23 = vsel %vm841_vm11, %v850_v20, %v752_v43 }
 0x97a   :  { %2007 = vmatmul.mubr.msk.bf16.vlgmr.msra.gmra.mxu1 %vm165_vm0, %v844_v22 }
 0x97b   :  { %1067 = vmatpush1.bf16.msra.mxu1 %v2556_v9  ;;  %1090 = vmatprep.mubr.bf16.mxu1 %v2451_v0 }
 0x97c   :  { %1068 = vmatprep.subr.bf16.mxu1 %v2565_v12 }
 0x97f   :  { %1069 = vmatpush1.bf16.msra.mxu1 %v2568_v13 }
 0x980   :  { %1070 = vmatprep.subr.bf16.mxu1 %v2571_v14 }
 0x983   :  { %1071 = vmatpush1.bf16.msra.mxu1 %v2573_v15 }
 0x984   :  { %1072 = vmatprep.subr.bf16.mxu1 %v2575_v16 }
 0x987   :  { %1073 = vmatpush1.bf16.msra.mxu1 %v2582_v17 }
 0x988   :  { %1260 = vmatprep.subr.bf16.mxu1 %v2554_v8 }
 0xa3a   :  { %v896_v5 = vpop.f32.mrf.mxu1 }
 0xa3b   :  { %v903_v40 = vadd.f32 %v896_v5, %v2679_v30  ;;  %v920_v30 = vpop.permute.xlu1 %919 }
 0xa3c   :  { %v898_v29 = vpop.f32.mrf.mxu1 }
 0xa3d   :  { %v904_v41 = vadd.f32 %v898_v29, %v2682_v31  ;;  %v2008_v45 = vmul.f32 -1.442695, %v903_v40 }
 0xa3e   :  { %v900_v43 = vpop.f32.mrf.mxu1 }
 0xa3f   :  { %2251 = vtanh.f32 %v904_v41  ;;  %v2009_v54 = vmul.f32 -1.442695, %v904_v41  ;;  %v2457_v43 = vmov 6  }
 0xa40   :  { %v901_v19 = vpop.f32.mrf.mxu1  ;;  %2253 = vpow2.f32 %v2008_v45 }
 0xa41   :  { %v1038_v19 = vsel %vm384_vm4, 5, %v2457_v43 }
 0xa42   :  { %vm1039_vm15 = vcmp.gt.s32.totalorder %v2766_v4, %v1038_v19 }
 0xa43   :  { %vm1041_vm1 = vmpackc.low %vm1039_vm15, %vm1039_vm15 }
 0xa4c   :  { %v2252_v44 = vpop.eup %2251 }
 0xa4d   :  { %924 = vrot.lane.b32.xlu0 %v2252_v44, %s2445_s12  ;;  %v2254_v18 = vpop.eup %2253 }
 0xa4e   :  { %v911_v21 = vadd.f32 1.0, %v2254_v18 }
 0xa50   :  { %2255 = vrcp.f32 %v911_v21 }
 0xa5d   :  { %v2256_v38 = vpop.eup %2255 }
 0xa5e   :  { %v922_v42 = vmul.f32 %v2256_v38, %v920_v30 }
 0xabf   :  { %v925_v28 = vpop.permute.xlu0 %924 }
 0xac0   :  { %v927_v48 = vmul.f32 %v2256_v38, %v925_v28 }
 0xac2   :  { %929 = vrot.lane.b32.xlu0 %v927_v48, %s2445_s12 }
 0xb34   :  { %v930_v56 = vpop.permute.xlu0 %929 }
 0xb35   :  { %v932_v31 = vadd.f32 %v930_v56, %v922_v42  ;;  %v2894_v56 = vld [vmem:[#allocation3 + $0x30] ss:$8 sps:$4 sm:$0xff]  }
 0xb37   :  { %2257 = vtanh.f32 %v932_v31  ;;  %945 = vrot.lane.b32.xlu0 %v932_v31, %s2445_s12  ;;  %v2898_v31 = vld [vmem:[#allocation3 + $0x24] ss:$8 sps:$4 sm:$0xff]  }
 0xb38   :  { %2259 = vpow2.f32 %v2009_v54  ;;  %v2904_v54 = vld [vmem:[#allocation3 + $0x14] ss:$8 sps:$4 sm:$0xff]  }
 0xb44   :  { %v2258_v53 = vpop.eup %2257 }
 0xb45   :  { %935 = vrot.lane.b32.xlu1 %v2258_v53, %s2445_s12  ;;  %v2260_v27 = vpop.eup %2259  ;;  %v2901_v53 = vld [vmem:[#allocation3 + $0x20] ss:$8 sps:$4 sm:$0xff]  }
 0xb46   :  { %v912_v49 = vadd.f32 1.0, %v2260_v27  ;;  %v2907_v27 = vld [vmem:[#allocation3 + $0x10] ss:$8 sps:$4 sm:$0xff]  }
 0xb48   :  { %2261 = vrcp.f32 %v912_v49  ;;  %v2910_v49 = vld [vmem:[#allocation3 + $0x4] ss:$8 sps:$4 sm:$0xff]  }
 0xb55   :  { %v2262_v63 = vpop.eup %2261 }
 0xba9   :  { %v946_v50 = vpop.permute.xlu0 %945 }
 0xbaa   :  { %v948_v24 = vsel %vm940_vm13, %v946_v50, %v849_v39 }
 0xbab   :  { %1018 = vrot.lane.b32.xlu0 %v948_v24, %s2445_s12 }
 0xbb7   :  { %v936_v57 = vpop.permute.xlu1 %935 }
 0xbb8   :  { %v938_v58 = vmul.f32 %v2262_v63, %v936_v57 }
 0xbba   :  { %v941_v1 = vpack.c.bf16 %v938_v58, %v938_v58  ;;  %v949_v25 = vmax.f32 %v851_v23, %v938_v58 }
 0xbbc   :  { %v943_v35 = vsel %vm942_vm14, %v941_v1, %v844_v22  ;;  %v950_v60 = vsel %vm940_vm13, %v949_v25, %v851_v23 }
 0xbbd   :  { %2010 = vmatmul.mubr.msk.bf16.vlgmr.msra.gmra.mxu0 %vm165_vm0, %v943_v35 }
 0xbbe   :  { %1164 = vmatpush1.bf16.msra.mxu0 %v2556_v9  ;;  %1187 = vmatprep.mubr.bf16.mxu0 %v2451_v0 }
 0xbbf   :  { %1165 = vmatprep.subr.bf16.mxu0 %v2565_v12 }
 0xbc2   :  { %1166 = vmatpush1.bf16.msra.mxu0 %v2568_v13 }
 0xbc3   :  { %1167 = vmatprep.subr.bf16.mxu0 %v2571_v14 }
 0xbc6   :  { %1168 = vmatpush1.bf16.msra.mxu0 %v2573_v15 }
 0xbc7   :  { %1169 = vmatprep.subr.bf16.mxu0 %v2575_v16 }
 0xbca   :  { %1170 = vmatpush1.bf16.msra.mxu0 %v2582_v17 }
 0xbcb   :  { %1357 = vmatprep.subr.bf16.mxu0 %v2554_v8 }
 0xc7d   :  { %v995_v39 = vpop.f32.mrf.mxu0 }
 0xc7e   :  { %v1002_v61 = vadd.f32 %v995_v39, %v2663_v6  ;;  %v1019_v6 = vpop.permute.xlu0 %1018 }
 0xc7f   :  { %v997_v9 = vpop.f32.mrf.mxu0 }
 0xc80   :  { %v1003_v62 = vadd.f32 %v997_v9, %v2666_v7  ;;  %v2011_v14 = vmul.f32 -1.442695, %v1002_v61 }
 0xc81   :  { %v999_v36 = vpop.f32.mrf.mxu0 }
 0xc82   :  { %2263 = vtanh.f32 %v1003_v62  ;;  %v2012_v40 = vmul.f32 -1.442695, %v1003_v62 }
 0xc83   :  { %v1000_v12 = vpop.f32.mrf.mxu0  ;;  %2265 = vpow2.f32 %v2011_v14 }
 0xc8f   :  { %v2264_v13 = vpop.eup %2263 }
 0xc90   :  { %1023 = vrot.lane.b32.xlu1 %v2264_v13, %s2445_s12  ;;  %v2266_v15 = vpop.eup %2265 }
 0xc91   :  { %v1010_v16 = vadd.f32 1.0, %v2266_v15 }
 0xc93   :  { %2267 = vrcp.f32 %v1010_v16 }
 0xca0   :  { %v2268_v17 = vpop.eup %2267 }
 0xca1   :  { %v1021_v22 = vmul.f32 %v2268_v17, %v1019_v6 }
 0xd02   :  { %v1024_v20 = vpop.permute.xlu1 %1023 }
 0xd03   :  { %v1026_v8 = vmul.f32 %v2268_v17, %v1024_v20  ;;  %v2458_v17 = vmov 5  }
 0xd04   :  { %v1135_v20 = vsel %vm384_vm4, 6, %v2458_v17 }
 0xd05   :  { %1028 = vrot.lane.b32.xlu1 %v1026_v8, %s2445_s12  ;;  %vm1136_vm2 = vcmp.gt.s32.totalorder %v2766_v4, %v1135_v20 }
 0xd06   :  { %vm1138_vm3 = vmpackc.low %vm1136_vm2, %vm1136_vm2 }
 0xd77   :  { %v1029_v23 = vpop.permute.xlu1 %1028 }
 0xd78   :  { %v1031_v7 = vadd.f32 %v1029_v23, %v1021_v22 }
 0xd7a   :  { %2269 = vtanh.f32 %v1031_v7  ;;  %1044 = vrot.lane.b32.xlu1 %v1031_v7, %s2445_s12 }
 0xd7b   :  { %2271 = vpow2.f32 %v2012_v40 }
 0xd87   :  { %v2270_v5 = vpop.eup %2269 }
 0xd88   :  { %1034 = vrot.lane.b32.xlu0 %v2270_v5, %s2445_s12  ;;  %v2272_v29 = vpop.eup %2271 }
 0xd89   :  { %v1011_v41 = vadd.f32 1.0, %v2272_v29 }
 0xd8b   :  { %2273 = vrcp.f32 %v1011_v41 }
 0xd98   :  { %v2274_v18 = vpop.eup %2273 }
 0xdec   :  { %v1045_v44 = vpop.permute.xlu1 %1044 }
 0xded   :  { %v2884_v45 = vsel %vm1039_vm15, %v1045_v44, %v948_v24 }
 0xdee   :  { %1115 = vrot.lane.b32.xlu1 %v2884_v45, %s2445_s12 }
 0xdfa   :  { %v1035_v21 = vpop.permute.xlu0 %1034 }
 0xdfb   :  { %v1037_v38 = vmul.f32 %v2274_v18, %v1035_v21 }
 0xdfd   :  { %v1040_v28 = vpack.c.bf16 %v1037_v38, %v1037_v38  ;;  %v1048_v48 = vmax.f32 %v950_v60, %v1037_v38 }
 0xdff   :  { %v2888_v30 = vsel %vm1041_vm1, %v1040_v28, %v943_v35  ;;  %v2890_v42 = vsel %vm1039_vm15, %v1048_v48, %v950_v60 }
 0xe00   :  { %2013 = vmatmul.mubr.msk.bf16.vlgmr.msra.gmra.mxu1 %vm165_vm0, %v2888_v30 }
 0xe01   :  { %1261 = vmatpush1.bf16.msra.mxu1 %v2894_v56  ;;  %1284 = vmatprep.mubr.bf16.mxu1 %v2451_v0 }
 0xe02   :  { %1262 = vmatprep.subr.bf16.mxu1 %v2898_v31 }
 0xe05   :  { %1263 = vmatpush1.bf16.msra.mxu1 %v2901_v53 }
 0xe06   :  { %1264 = vmatprep.subr.bf16.mxu1 %v2904_v54 }
 0xe09   :  { %1265 = vmatpush1.bf16.msra.mxu1 %v2907_v27 }
 0xe0a   :  { %1266 = vmatprep.subr.bf16.mxu1 %v2910_v49 }
 0xe0d   :  { %1267 = vmatpush1.bf16.msra.mxu1 %v2913_v55 }
 0xe0e   :  { %1454 = vmatprep.subr.bf16.mxu1 %v2356_v59 }
 0xec0   :  { %v1092_v50 = vpop.f32.mrf.mxu1 }
 0xec1   :  { %v1099_v24 = vadd.f32 %v1092_v50, %v2669_v10  ;;  %v1116_v10 = vpop.permute.xlu1 %1115 }
 0xec2   :  { %v1094_v63 = vpop.f32.mrf.mxu1 }
 0xec3   :  { %v1100_v57 = vadd.f32 %v1094_v63, %v2672_v11  ;;  %v2014_v35 = vmul.f32 -1.442695, %v1099_v24 }
 0xec4   :  { %v1096_v58 = vpop.f32.mrf.mxu1 }
 0xec5   :  { %2275 = vtanh.f32 %v1100_v57  ;;  %v2015_v14 = vmul.f32 -1.442695, %v1100_v57 }
 0xec6   :  { %v1097_v1 = vpop.f32.mrf.mxu1  ;;  %2277 = vpow2.f32 %v2014_v35  ;;  %v2459_v35 = vmov 4  }
 0xed2   :  { %v2276_v25 = vpop.eup %2275 }
 0xed3   :  { %1120 = vrot.lane.b32.xlu0 %v2276_v25, %s2445_s12  ;;  %v2278_v60 = vpop.eup %2277 }
 0xed4   :  { %v1107_v39 = vadd.f32 1.0, %v2278_v60  ;;  %v1232_v60 = vsel %vm384_vm4, 7, %v2459_v35 }
 0xed5   :  { %vm1233_vm5 = vcmp.gt.s32.totalorder %v2766_v4, %v1232_v60 }
 0xed6   :  { %2279 = vrcp.f32 %v1107_v39  ;;  %vm1235_vm6 = vmpackc.low %vm1233_vm5, %vm1233_vm5 }
 0xee3   :  { %v2280_v61 = vpop.eup %2279 }
 0xee4   :  { %v1118_v36 = vmul.f32 %v2280_v61, %v1116_v10 }
 0xf45   :  { %v1121_v9 = vpop.permute.xlu0 %1120 }
 0xf46   :  { %v1123_v62 = vmul.f32 %v2280_v61, %v1121_v9 }
 0xf48   :  { %1125 = vrot.lane.b32.xlu0 %v1123_v62, %s2445_s12 }
 0xfba   :  { %v1126_v12 = vpop.permute.xlu0 %1125 }
 0xfbb   :  { %v1128_v11 = vadd.f32 %v1126_v12, %v1118_v36 }
 0xfbd   :  { %2281 = vtanh.f32 %v1128_v11  ;;  %1141 = vrot.lane.b32.xlu0 %v1128_v11, %s2445_s12 }
 0xfbe   :  { %2283 = vpow2.f32 %v2015_v14 }
 0xfca   :  { %v2282_v13 = vpop.eup %2281 }
 0xfcb   :  { %1131 = vrot.lane.b32.xlu1 %v2282_v13, %s2445_s12  ;;  %v2284_v15 = vpop.eup %2283 }
 0xfcc   :  { %v1108_v16 = vadd.f32 1.0, %v2284_v15 }
 0xfce   :  { %2285 = vrcp.f32 %v1108_v16 }
 0xfdb   :  { %v2286_v22 = vpop.eup %2285 }
0x102f   :  { %v1142_v8 = vpop.permute.xlu0 %1141 }
0x1030   :  { %v1144_v6 = vsel %vm1136_vm2, %v1142_v8, %v2884_v45 }
0x1031   :  { %1212 = vrot.lane.b32.xlu0 %v1144_v6, %s2445_s12 }
0x103d   :  { %v1132_v23 = vpop.permute.xlu1 %1131 }
0x103e   :  { %v1134_v7 = vmul.f32 %v2286_v22, %v1132_v23 }
0x1040   :  { %v1137_v5 = vpack.c.bf16 %v1134_v7, %v1134_v7  ;;  %v1145_v40 = vmax.f32 %v2890_v42, %v1134_v7 }
0x1042   :  { %v1139_v29 = vsel %vm1138_vm3, %v1137_v5, %v2888_v30  ;;  %v1146_v41 = vsel %vm1136_vm2, %v1145_v40, %v2890_v42 }
0x1043   :  { %2016 = vmatmul.mubr.msk.bf16.vlgmr.msra.gmra.mxu0 %vm165_vm0, %v1139_v29 }
0x1044   :  { %1358 = vmatpush1.bf16.msra.mxu0 %v2894_v56  ;;  %1381 = vmatprep.mubr.bf16.mxu0 %v2451_v0 }
0x1045   :  { %1359 = vmatprep.subr.bf16.mxu0 %v2898_v31 }
0x1048   :  { %1360 = vmatpush1.bf16.msra.mxu0 %v2901_v53 }
0x1049   :  { %1361 = vmatprep.subr.bf16.mxu0 %v2904_v54 }
0x104c   :  { %1362 = vmatpush1.bf16.msra.mxu0 %v2907_v27 }
0x104d   :  { %1363 = vmatprep.subr.bf16.mxu0 %v2910_v49 }
0x1050   :  { %1364 = vmatpush1.bf16.msra.mxu0 %v2913_v55 }
0x1051   :  { %1551 = vmatprep.subr.bf16.mxu0 %v2356_v59 }
0x1103   :  { %v1189_v43 = vpop.f32.mrf.mxu0 }
0x1104   :  { %v1196_v19 = vadd.f32 %v1189_v43, %v2685_v33  ;;  %v1213_v33 = vpop.permute.xlu0 %1212 }
0x1105   :  { %v1191_v44 = vpop.f32.mrf.mxu0 }
0x1106   :  { %v1197_v45 = vadd.f32 %v1191_v44, %v2688_v34  ;;  %v2017_v28 = vmul.f32 -1.442695, %v1196_v19 }
0x1107   :  { %v1193_v18 = vpop.f32.mrf.mxu0 }
0x1108   :  { %2287 = vtanh.f32 %v1197_v45  ;;  %v2018_v58 = vmul.f32 -1.442695, %v1197_v45 }
0x1109   :  { %v1194_v21 = vpop.f32.mrf.mxu0  ;;  %2289 = vpow2.f32 %v2017_v28 }
0x110a   :  { %v2460_v21 = vmov 3  }
0x1115   :  { %v2288_v38 = vpop.eup %2287 }
0x1116   :  { %1217 = vrot.lane.b32.xlu1 %v2288_v38, %s2445_s12  ;;  %v2290_v48 = vpop.eup %2289  ;;  %v1329_v38 = vsel %vm384_vm4, 8, %v2460_v21 }
0x1117   :  { %v1204_v30 = vadd.f32 1.0, %v2290_v48  ;;  %vm1330_vm7 = vcmp.gt.s32.totalorder %v2766_v4, %v1329_v38 }
0x1118   :  { %vm1332_vm8 = vmpackc.low %vm1330_vm7, %vm1330_vm7 }
0x1119   :  { %2291 = vrcp.f32 %v1204_v30 }
0x1126   :  { %v2292_v42 = vpop.eup %2291 }
0x1127   :  { %v1215_v24 = vmul.f32 %v2292_v42, %v1213_v33 }
0x1188   :  { %v1218_v50 = vpop.permute.xlu1 %1217 }
0x1189   :  { %v1220_v59 = vmul.f32 %v2292_v42, %v1218_v50 }
0x118b   :  { %1222 = vrot.lane.b32.xlu1 %v1220_v59, %s2445_s12 }
0x11fd   :  { %v1223_v63 = vpop.permute.xlu1 %1222 }
0x11fe   :  { %v1225_v34 = vadd.f32 %v1223_v63, %v1215_v24 }
0x1200   :  { %2293 = vtanh.f32 %v1225_v34  ;;  %1238 = vrot.lane.b32.xlu1 %v1225_v34, %s2445_s12 }
0x1201   :  { %2295 = vpow2.f32 %v2018_v58 }
0x120d   :  { %v2294_v57 = vpop.eup %2293 }
0x120e   :  { %1228 = vrot.lane.b32.xlu0 %v2294_v57, %s2445_s12  ;;  %v2296_v1 = vpop.eup %2295 }
0x120f   :  { %v1205_v25 = vadd.f32 1.0, %v2296_v1 }
0x1211   :  { %2297 = vrcp.f32 %v1205_v25 }
0x121e   :  { %v2298_v9 = vpop.eup %2297 }
0x1272   :  { %v1239_v39 = vpop.permute.xlu1 %1238 }
0x1273   :  { %v1241_v61 = vsel %vm1233_vm5, %v1239_v39, %v1144_v6 }
0x1274   :  { %1309 = vrot.lane.b32.xlu1 %v1241_v61, %s2445_s12 }
0x1280   :  { %v1229_v62 = vpop.permute.xlu0 %1228 }
0x1281   :  { %v1231_v10 = vmul.f32 %v2298_v9, %v1229_v62 }
0x1283   :  { %v1234_v36 = vpack.c.bf16 %v1231_v10, %v1231_v10  ;;  %v1242_v12 = vmax.f32 %v1146_v41, %v1231_v10 }
0x1285   :  { %v1236_v11 = vsel %vm1235_vm6, %v1234_v36, %v1139_v29  ;;  %v1243_v13 = vsel %vm1233_vm5, %v1242_v12, %v1146_v41  ;;  %v2461_v36 = vmov 2  }
0x1286   :  { %2019 = vmatmul.mubr.msk.bf16.vlgmr.msra.gmra.mxu1 %vm165_vm0, %v1236_v11  ;;  %v1426_v12 = vsel %vm384_vm4, 9, %v2461_v36 }
0x1287   :  { %1455 = vmatpush1.bf16.msra.mxu1 %v2894_v56  ;;  %1478 = vmatprep.mubr.bf16.mxu1 %v2451_v0  ;;  %vm1427_vm9 = vcmp.gt.s32.totalorder %v2766_v4, %v1426_v12 }
0x1288   :  { %1456 = vmatprep.subr.bf16.mxu1 %v2898_v31  ;;  %vm1429_vm10 = vmpackc.low %vm1427_vm9, %vm1427_vm9 }
0x128b   :  { %1457 = vmatpush1.bf16.msra.mxu1 %v2901_v53 }
0x128c   :  { %1458 = vmatprep.subr.bf16.mxu1 %v2904_v54 }
0x128f   :  { %1459 = vmatpush1.bf16.msra.mxu1 %v2907_v27 }
0x1290   :  { %1460 = vmatprep.subr.bf16.mxu1 %v2910_v49 }
0x1293   :  { %1461 = vmatpush1.bf16.msra.mxu1 %v2913_v55 }
0x1346   :  { %v1286_v14 = vpop.f32.mrf.mxu1 }
0x1347   :  { %v1293_v15 = vadd.f32 %v1286_v14, %v2701_v51  ;;  %v1310_v51 = vpop.permute.xlu1 %1309 }
0x1348   :  { %v1288_v16 = vpop.f32.mrf.mxu1 }
0x1349   :  { %v1294_v17 = vadd.f32 %v1288_v16, %v2704_v52  ;;  %v2020_v22 = vmul.f32 -1.442695, %v1293_v15 }
0x134a   :  { %v1290_v20 = vpop.f32.mrf.mxu1 }
0x134b   :  { %2299 = vtanh.f32 %v1294_v17  ;;  %v2021_v44 = vmul.f32 -1.442695, %v1294_v17 }
0x134c   :  { %v1291_v8 = vpop.f32.mrf.mxu1  ;;  %2301 = vpow2.f32 %v2020_v22 }
0x1358   :  { %v2300_v6 = vpop.eup %2299 }
0x1359   :  { %1314 = vrot.lane.b32.xlu0 %v2300_v6, %s2445_s12  ;;  %v2302_v23 = vpop.eup %2301 }
0x135a   :  { %v1301_v7 = vadd.f32 1.0, %v2302_v23 }
0x135c   :  { %2303 = vrcp.f32 %v1301_v7 }
0x1369   :  { %v2304_v5 = vpop.eup %2303 }
0x136a   :  { %v1312_v41 = vmul.f32 %v2304_v5, %v1310_v51 }
0x13cb   :  { %v1315_v40 = vpop.permute.xlu0 %1314 }
0x13cc   :  { %v1317_v29 = vmul.f32 %v2304_v5, %v1315_v40 }
0x13ce   :  { %1319 = vrot.lane.b32.xlu0 %v1317_v29, %s2445_s12 }
0x1440   :  { %v1320_v43 = vpop.permute.xlu0 %1319 }
0x1441   :  { %v1322_v52 = vadd.f32 %v1320_v43, %v1312_v41 }
0x1443   :  { %2305 = vtanh.f32 %v1322_v52  ;;  %1335 = vrot.lane.b32.xlu0 %v1322_v52, %s2445_s12 }
0x1444   :  { %2307 = vpow2.f32 %v2021_v44 }
0x1450   :  { %v2306_v19 = vpop.eup %2305 }
0x1451   :  { %1325 = vrot.lane.b32.xlu1 %v2306_v19, %s2445_s12  ;;  %v2308_v45 = vpop.eup %2307 }
0x1452   :  { %v1302_v18 = vadd.f32 1.0, %v2308_v45 }
0x1454   :  { %2309 = vrcp.f32 %v1302_v18 }
0x1461   :  { %v2310_v30 = vpop.eup %2309 }
0x14b5   :  { %v1336_v28 = vpop.permute.xlu0 %1335 }
0x14b6   :  { %v1338_v48 = vsel %vm1330_vm7, %v1336_v28, %v1241_v61 }
0x14b7   :  { %1406 = vrot.lane.b32.xlu0 %v1338_v48, %s2445_s12 }
0x14c3   :  { %v1326_v42 = vpop.permute.xlu1 %1325 }
0x14c4   :  { %v1328_v50 = vmul.f32 %v2310_v30, %v1326_v42  ;;  %v2462_v42 = vmov 1  }
0x14c6   :  { %v1331_v59 = vpack.c.bf16 %v1328_v50, %v1328_v50  ;;  %v1339_v33 = vmax.f32 %v1243_v13, %v1328_v50  ;;  %v1523_v50 = vsel %vm384_vm4, 10, %v2462_v42  ;;  %v2196_v42 = vld [vmem:[#allocation8 + $0x30] sm:$0xff]  }
0x14c7   :  { %vm1524_vm11 = vcmp.gt.s32.totalorder %v2766_v4, %v1523_v50 }
0x14c8   :  { %v1333_v24 = vsel %vm1332_vm8, %v1331_v59, %v1236_v11  ;;  %v1340_v63 = vsel %vm1330_vm7, %v1339_v33, %v1243_v13  ;;  %vm1526_vm12 = vmpackc.low %vm1524_vm11, %vm1524_vm11 }
0x14c9   :  { %2022 = vmatmul.mubr.msk.bf16.vlgmr.msra.gmra.mxu0 %vm165_vm0, %v1333_v24 }
0x14ca   :  { %1552 = vmatpush1.bf16.msra.mxu0 %v2894_v56  ;;  %1575 = vmatprep.mubr.bf16.mxu0 %v2451_v0 }
0x14cb   :  { %1553 = vmatprep.subr.bf16.mxu0 %v2898_v31 }
0x14ce   :  { %1554 = vmatpush1.bf16.msra.mxu0 %v2901_v53 }
0x14cf   :  { %1555 = vmatprep.subr.bf16.mxu0 %v2904_v54 }
0x14d2   :  { %1556 = vmatpush1.bf16.msra.mxu0 %v2907_v27 }
0x14d3   :  { %1557 = vmatprep.subr.bf16.mxu0 %v2910_v49 }
0x14d6   :  { %1558 = vmatpush1.bf16.msra.mxu0 %v2913_v55 }
0x1589   :  { %v1383_v34 = vpop.f32.mrf.mxu0 }
0x158a   :  { %v1390_v57 = vadd.f32 %v1383_v34, %v2719_v2  ;;  %v1407_v2 = vpop.permute.xlu0 %1406 }
0x158b   :  { %v1385_v58 = vpop.f32.mrf.mxu0 }
0x158c   :  { %v1391_v56 = vadd.f32 %v1385_v58, %v2722_v3  ;;  %v2023_v53 = vmul.f32 -1.442695, %v1390_v57 }
0x158d   :  { %v1387_v1 = vpop.f32.mrf.mxu0 }
0x158e   :  { %2311 = vtanh.f32 %v1391_v56  ;;  %v2024_v9 = vmul.f32 -1.442695, %v1391_v56 }
0x158f   :  { %v1388_v25 = vpop.f32.mrf.mxu0  ;;  %2313 = vpow2.f32 %v2023_v53 }
0x159b   :  { %v2312_v31 = vpop.eup %2311 }
0x159c   :  { %1411 = vrot.lane.b32.xlu1 %v2312_v31, %s2445_s12  ;;  %v2314_v54 = vpop.eup %2313 }
0x159d   :  { %v1398_v27 = vadd.f32 1.0, %v2314_v54 }
0x159f   :  { %2315 = vrcp.f32 %v1398_v27 }
0x15ac   :  { %v2316_v49 = vpop.eup %2315 }
0x15ad   :  { %v1409_v60 = vmul.f32 %v2316_v49, %v1407_v2 }
0x160e   :  { %v1412_v35 = vpop.permute.xlu1 %1411 }
0x160f   :  { %v1414_v55 = vmul.f32 %v2316_v49, %v1412_v35 }
0x1611   :  { %1416 = vrot.lane.b32.xlu1 %v1414_v55, %s2445_s12 }
0x1683   :  { %v1417_v39 = vpop.permute.xlu1 %1416 }
0x1684   :  { %v1419_v3 = vadd.f32 %v1417_v39, %v1409_v60  ;;  %v2357_v39 = vld [vmem:[%s3029_s1] sm:$0xff] }
0x1685   :  { %vm1624_vm13 = vcmp.gt.s32.totalorder %v2357_v39, 0 }
0x1686   :  { %2317 = vtanh.f32 %v1419_v3  ;;  %1432 = vrot.lane.b32.xlu1 %v1419_v3, %s2445_s12 }
0x1687   :  { %2319 = vpow2.f32 %v2024_v9 }
0x1693   :  { %v2318_v61 = vpop.eup %2317 }
0x1694   :  { %1422 = vrot.lane.b32.xlu0 %v2318_v61, %s2445_s12  ;;  %v2320_v62 = vpop.eup %2319 }
0x1695   :  { %v1399_v10 = vadd.f32 1.0, %v2320_v62 }
0x1697   :  { %2321 = vrcp.f32 %v1399_v10 }
0x16a4   :  { %v2322_v14 = vpop.eup %2321 }
0x16f8   :  { %v1433_v11 = vpop.permute.xlu1 %1432 }
0x16f9   :  { %v1435_v13 = vsel %vm1427_vm9, %v1433_v11, %v1338_v48  ;;  %v2179_v11 = vld [vmem:[#allocation6 + $0x78] sm:$0xff]  }
0x16fa   :  { %1503 = vrot.lane.b32.xlu1 %v1435_v13, %s2445_s12  ;;  %2069 = vmatprep.subr.bf16.mxu1 %v2179_v11 }
0x1706   :  { %v1423_v15 = vpop.permute.xlu0 %1422 }
0x1707   :  { %v1425_v16 = vmul.f32 %v2322_v14, %v1423_v15  ;;  %v2181_v14 = vld [vmem:[#allocation6 + $0x70] sm:$0xff]  }
0x1708   :  { %v2182_v15 = vld [vmem:[#allocation6 + $0x30] sm:$0xff]  }
0x1709   :  { %v1428_v17 = vpack.c.bf16 %v1425_v16, %v1425_v16  ;;  %v1436_v20 = vmax.f32 %v1340_v63, %v1425_v16  ;;  %v2183_v16 = vld [vmem:[#allocation6 + $0x68] sm:$0xff]  }
0x170b   :  { %v1430_v8 = vsel %vm1429_vm10, %v1428_v17, %v1333_v24  ;;  %v1437_v6 = vsel %vm1427_vm9, %v1436_v20, %v1340_v63  ;;  %v2184_v17 = vld [vmem:[#allocation6 + $0x28] sm:$0xff]   ;;  %v2185_v20 = vld [vmem:[#allocation6 + $0x60] sm:$0xff]  }
0x170c   :  { %2025 = vmatmul.mubr.msk.bf16.vlgmr.msra.gmra.mxu1 %vm165_vm0, %v1430_v8 }
0x17cc   :  { %v1480_v22 = vpop.f32.mrf.mxu1 }
0x17cd   :  { %v1487_v23 = vadd.f32 %v1480_v22, %v2739_v26  ;;  %v1504_v26 = vpop.permute.xlu1 %1503  ;;  %v2188_v22 = vld [vmem:[#allocation6 + $0x18] sm:$0xff]  }
0x17ce   :  { %v1482_v7 = vpop.f32.mrf.mxu1 }
0x17cf   :  { %v1488_v5 = vadd.f32 %v1482_v7, %v2742_v32  ;;  %v2026_v41 = vmul.f32 -1.442695, %v1487_v23  ;;  %v2189_v23 = vld [vmem:[#allocation6 + $0x50] sm:$0xff]  }
0x17d0   :  { %v1484_v40 = vpop.f32.mrf.mxu1  ;;  %v2190_v7 = vld [vmem:[#allocation6 + $0x10] sm:$0xff]  }
0x17d1   :  { %2323 = vtanh.f32 %v1488_v5  ;;  %v2027_v28 = vmul.f32 -1.442695, %v1488_v5  ;;  %v2191_v5 = vld [vmem:[#allocation6 + $0x48] sm:$0xff]  }
0x17d2   :  { %v1485_v29 = vpop.f32.mrf.mxu1  ;;  %2325 = vpow2.f32 %v2026_v41  ;;  %v2192_v40 = vld [vmem:[#allocation6 + $0x8] sm:$0xff]  }
0x17de   :  { %v2324_v51 = vpop.eup %2323 }
0x17df   :  { %1508 = vrot.lane.b32.xlu0 %v2324_v51, %s2445_s12  ;;  %v2326_v43 = vpop.eup %2325 }
0x17e0   :  { %v1495_v52 = vadd.f32 1.0, %v2326_v43 }
0x17e2   :  { %2327 = vrcp.f32 %v1495_v52 }
0x17ef   :  { %v2328_v19 = vpop.eup %2327 }
0x17f0   :  { %v1506_v18 = vmul.f32 %v2328_v19, %v1504_v26  ;;  %v1620_v26 = vsel %vm384_vm4, 11, %v2451_v0 }
0x17f1   :  { %vm1621_vm15 = vcmp.gt.s32.totalorder %v2766_v4, %v1620_v26 }
0x1851   :  { %v1509_v44 = vpop.permute.xlu0 %1508 }
0x1852   :  { %v1511_v45 = vmul.f32 %v2328_v19, %v1509_v44  ;;  %v2193_v44 = vld [vmem:[#allocation6 + $0x40] sm:$0xff]  }
0x1854   :  { %1513 = vrot.lane.b32.xlu0 %v1511_v45, %s2445_s12 }
0x18c6   :  { %v1514_v21 = vpop.permute.xlu0 %1513 }
0x18c7   :  { %v1516_v32 = vadd.f32 %v1514_v21, %v1506_v18  ;;  %v2194_v18 = vld [vmem:[#allocation6] sm:$0xff]  }
0x18c9   :  { %2329 = vtanh.f32 %v1516_v32  ;;  %1529 = vrot.lane.b32.xlu0 %v1516_v32, %s2445_s12 }
0x18ca   :  { %2331 = vpow2.f32 %v2027_v28  ;;  %v2195_v28 = vld [vmem:[#allocation8 + $0x38] sm:$0xff]  }
0x18d6   :  { %v2330_v38 = vpop.eup %2329 }
0x18d7   :  { %1519 = vrot.lane.b32.xlu1 %v2330_v38, %s2445_s12  ;;  %v2332_v48 = vpop.eup %2331 }
0x18d8   :  { %v1496_v30 = vadd.f32 1.0, %v2332_v48 }
0x18da   :  { %2333 = vrcp.f32 %v1496_v30  ;;  %v2463_v30 = vmov 0.0  }
0x18db   :  { %2100 = vmatprep.subr.bf16.mxu0 %v2463_v30 }
0x18e7   :  { %v2334_v24 = vpop.eup %2333 }
0x193b   :  { %v1530_v59 = vpop.permute.xlu0 %1529 }
0x193c   :  { %v1532_v33 = vsel %vm1524_vm11, %v1530_v59, %v1435_v13  ;;  %v2180_v13 = vld [vmem:[#allocation6 + $0x38] sm:$0xff]  }
0x193d   :  { %1600 = vrot.lane.b32.xlu0 %v1532_v33, %s2445_s12  ;;  %2070 = vmatpush3.bf16.msra.mxu1 %v2180_v13 }
0x193e   :  { %2071 = vmatprep.subr.bf16.mxu1 %v2181_v14 }
0x1941   :  { %2072 = vmatpush3.bf16.msra.mxu1 %v2182_v15 }
0x1942   :  { %2073 = vmatprep.subr.bf16.mxu1 %v2183_v16 }
0x1945   :  { %2074 = vmatpush3.bf16.msra.mxu1 %v2184_v17 }
0x1946   :  { %2075 = vmatprep.subr.bf16.mxu1 %v2185_v20 }
0x1949   :  { %v1520_v63 = vpop.permute.xlu1 %1519 }
0x194a   :  { %v1522_v34 = vmul.f32 %v2334_v24, %v1520_v63 }
0x194c   :  { %v1525_v57 = vpack.c.bf16 %v1522_v34, %v1522_v34  ;;  %v1533_v58 = vmax.f32 %v1437_v6, %v1522_v34 }
0x194e   :  { %v1527_v56 = vsel %vm1526_vm12, %v1525_v57, %v1430_v8  ;;  %v2998_v1 = vsel %vm1524_vm11, %v1533_v58, %v1437_v6  ;;  %v2186_v8 = vld [vmem:[#allocation6 + $0x20] sm:$0xff]   ;;  %v2187_v6 = vld [vmem:[#allocation6 + $0x58] sm:$0xff]  }
0x194f   :  { %2028 = vmatmul.mubr.msk.bf16.vlgmr.msra.gmra.mxu0 %vm165_vm0, %v1527_v56  ;;  %2076 = vmatpush3.bf16.msra.mxu1 %v2186_v8  ;;  %v2197_v56 = vld [vmem:[#allocation8 + $0x28] sm:$0xff]  }
0x1950   :  { %2077 = vmatprep.subr.bf16.mxu1 %v2187_v6  ;;  %2101 = vmatpush3.bf16.msra.mxu0 %v2195_v28 }
0x1951   :  { %2102 = vmatprep.subr.bf16.mxu0 %v2463_v30 }
0x1953   :  { %2078 = vmatpush3.bf16.msra.mxu1 %v2188_v22 }
0x1954   :  { %2079 = vmatprep.subr.bf16.mxu1 %v2189_v23  ;;  %2103 = vmatpush3.bf16.msra.mxu0 %v2196_v42 }
0x1955   :  { %2104 = vmatprep.subr.bf16.mxu0 %v2463_v30 }
0x1957   :  { %2080 = vmatpush3.bf16.msra.mxu1 %v2190_v7 }
0x1958   :  { %2081 = vmatprep.subr.bf16.mxu1 %v2191_v5  ;;  %2105 = vmatpush3.bf16.msra.mxu0 %v2197_v56 }
0x1959   :  { %2106 = vmatprep.subr.bf16.mxu0 %v2463_v30 }
0x195b   :  { %2082 = vmatpush3.bf16.msra.mxu1 %v2192_v40 }
0x195c   :  { %2083 = vmatprep.subr.bf16.mxu1 %v2193_v44 }
0x195f   :  { %2084 = vmatpush3.bf16.msra.mxu1 %v2194_v18 }
0x19af   :  { %v1601_v9 = vpop.permute.xlu0 %1600 }
0x1a0f   :  { %v1577_v25 = vpop.f32.mrf.mxu0 }
0x1a10   :  { %v1584_v31 = vadd.f32 %v1577_v25, %v2751_v46  ;;  %v1625_v46 = vsel %vm1624_vm13, 1, %v2451_v0  ;;  %v2199_v25 = vld [vmem:[#allocation8 + $0x18] sm:$0xff]  }
0x1a11   :  { %v1579_v53 = vpop.f32.mrf.mxu0  ;;  %1627 = vperm.xlu0 %2143, %v1625_v46  }
0x1a12   :  { %v1585_v54 = vadd.f32 %v1579_v53, %v2754_v47  ;;  %v2029_v55 = vmul.f32 -1.442695, %v1584_v31  ;;  %v2200_v31 = vld [vmem:[#allocation8 + $0x10] sm:$0xff]   ;;  %v2201_v53 = vld [vmem:[#allocation8 + $0x8] sm:$0xff]  }
0x1a13   :  { %v1581_v27 = vpop.f32.mrf.mxu0 }
0x1a14   :  { %2335 = vtanh.f32 %v1585_v54  ;;  %v2030_v29 = vmul.f32 -1.442695, %v1585_v54  ;;  %v2202_v54 = vld [vmem:[#allocation8] sm:$0xff]  }
0x1a15   :  { %v1582_v49 = vpop.f32.mrf.mxu0  ;;  %2337 = vpow2.f32 %v2029_v55 }
0x1a16   :  { %v2031_v49 = vld [vmem:[%s3034_s6] ss:$0 sm:$0xff]  ;;  %s2418_s6 = scalar_lea.vmem %s1947_s16, 128 }
0x1a17   :  { %p2419_p1 = scmp.ne.s32.totalorder %s1947_s16, %s2418_s6  ;;  %p2424_p3 = scmp.lt.s32.totalorder %s2418_s6, %s2418_s6 }
0x1a19   :  { %p2425_p4 = por %p2424_p3, %p2423_p2 }
0x1a1b   :  { %p2426_p5 = pnand %p2425_p4, %p2419_p1 }
0x1a21   :  { %v2336_v35 = vpop.eup %2335 }
0x1a22   :  { %1605 = vrot.lane.b32.xlu1 %v2336_v35, %s2445_s12  ;;  %v2338_v2 = vpop.eup %2337 }
0x1a23   :  { %v1592_v60 = vadd.f32 1.0, %v2338_v2 }
0x1a25   :  { %2339 = vrcp.f32 %v1592_v60 }
0x1a32   :  { %v2340_v47 = vpop.eup %2339 }
0x1a33   :  { %v1603_v62 = vmul.f32 %v2340_v47, %v1601_v9 }
0x1a8c   :  { %v1628_v19 = vpop.permute.xlu0 %1627 }
0x1a8d   :  { %vm1629_vm14 = vcmp.eq.s32.totalorder %v1628_v19, 1 }
0x1a94   :  { %v1606_v3 = vpop.permute.xlu1 %1605 }
0x1a95   :  { %v1608_v61 = vmul.f32 %v2340_v47, %v1606_v3  ;;  %v2048_v3 = vld [vmem:[%s3036_s8] ss:$0 sm:$0xff] }
0x1a97   :  { %1610 = vrot.lane.b32.xlu1 %v1608_v61, %s2445_s12 }
0x1b09   :  { %v1611_v10 = vpop.permute.xlu1 %1610 }
0x1b0a   :  { %v1613_v36 = vadd.f32 %v1611_v10, %v1603_v62 }
0x1b0c   :  { %2341 = vtanh.f32 %v1613_v36 }
0x1b0d   :  { %2343 = vpow2.f32 %v2030_v29 }
0x1b19   :  { %v2342_v12 = vpop.eup %2341 }
0x1b1a   :  { %1616 = vrot.lane.b32.xlu1 %v2342_v12, %s2445_s12  ;;  %v2344_v51 = vpop.eup %2343 }
0x1b1b   :  { %v1593_v41 = vadd.f32 1.0, %v2344_v51 }
0x1b1d   :  { %2345 = vrcp.f32 %v1593_v41 }
0x1b2a   :  { %v2346_v43 = vpop.eup %2345 }
0x1b8c   :  { %v1617_v52 = vpop.permute.xlu1 %1616 }
0x1b8d   :  { %v1619_v45 = vmul.f32 %v2346_v43, %v1617_v52 }
0x1b8f   :  { %v1622_v21 = vmax.f32 %v2998_v1, %v1619_v45 }
0x1b91   :  { %v1623_v32 = vsel %vm1621_vm15, %v1622_v21, %v2998_v1  ;;  %v2198_v1 = vld [vmem:[#allocation8 + $0x20] sm:$0xff]  }
0x1b92   :  { %v1630_v38 = vsel %vm1629_vm14, %v1623_v32, 0.0  ;;  %2107 = vmatpush3.bf16.msra.mxu0 %v2198_v1 }
0x1b93   :  { %v1632_v48 = vrot.slane %v1630_v38, 4  ;;  %2108 = vmatprep.subr.bf16.mxu0 %v2463_v30 }
0x1b95   :  { %v1638_v50 = vmul.f32 %v1632_v48, %v1630_v38  ;;  %v1636_v37 = vsub.f32 %v1630_v38, %v1632_v48 }
0x1b96   :  { %2109 = vmatpush3.bf16.msra.mxu0 %v2199_v25 }
0x1b97   :  { %v2144_v0 = vpack.i.bf16 %v1632_v48, %v1638_v50  ;;  %v1637_v33 = vand.u32 2147483647, %v1636_v37  ;;  %2110 = vmatprep.subr.bf16.mxu0 %v2463_v30 }
0x1b99   :  { %2145 = vrot.lane.b32.xlu1 %v2144_v0, %s2445_s12 }
0x1b9a   :  { %2111 = vmatpush3.bf16.msra.mxu0 %v2200_v31 }
0x1b9b   :  { %2112 = vmatprep.subr.bf16.mxu0 %v2463_v30 }
0x1b9e   :  { %2113 = vmatpush3.bf16.msra.mxu0 %v2201_v53 }
0x1b9f   :  { %2114 = vmatprep.subr.bf16.mxu0 %v2463_v30 }
0x1ba2   :  { %2115 = vmatpush3.bf16.msra.mxu0 %v2202_v54 }
0x1c0b   :  { %v2146_v59 = vpop.permute.xlu1 %2145 }
0x1c0c   :  { %v2148_v4 = vunpack.i.h.bf16 %v2146_v59  ;;  %v2147_v24 = vunpack.i.l.bf16 %v2146_v59 }
0x1c0e   :  { %v1647_v63 = vsel %vm165_vm0, %v1630_v38, %v2148_v4  ;;  %v1648_v34 = vsel %vm165_vm0, %v1637_v33, %v2147_v24  ;;  %vm2464_vm0 = vmmov 0  }
0x1c0f   :  { %v1649_v57 = vpack.c.bf16 %v1647_v63, %v1647_v63  ;;  %v1650_v58 = vpack.c.bf16 %v1648_v34, %v1648_v34  ;;  %2116 = vmatprep.mubr.msk.bf16.mxu0 %vm2464_vm0, %v2463_v30 }
0x1c11   :  { %1818 = vmatprep.mubr.bf16.mxu1 %v1650_v58 }
0x1c12   :  { %1819 = vmatmul.mubr.bf16.vlgmr.msra.gmra.mxu1 %v1649_v57 }
0x1cd2   :  { %v2085_v27 = vpop.f32.mrf.mxu1 }
0x1cd4   :  { %v2086_v35 = vpop.f32.mrf.mxu1 }
0x1cd5   :  { %v2087_v55 = vadd.f32 %v2086_v35, %v2085_v27 }
0x1cd6   :  { %v2088_v2 = vpop.f32.mrf.mxu1 }
0x1cd7   :  { %v1821_v60 = vadd.f32 %v2087_v55, %v2031_v49 }
0x1cd8   :  { %v2089_v39 = vpop.f32.mrf.mxu1 }
0x1cd9   :  { %2347 = vtanh.f32 %v1821_v60 }
0x1ce6   :  { %v2348_v46 = vpop.eup %2347 }
0x1ce7   :  { %v1827_v47 = vpack.c.bf16 %v2348_v46, %v2348_v46 }
0x1ce9   :  { %2117 = vmatmul.mubr.bf16.vlgmr.msra.gmra.mxu0 %v1827_v47 }
0x1da9   :  { %v1933_v61 = vpop.f32.mrf.mxu0 }
0x1daa   :  { %v1934_v9 = vadd.f32 %v2048_v3, %v1933_v61 }
0x1dab   :  { %v2118_v62 = vpop.f32.mrf.mxu0 }
0x1dac   :  { %1939 = vst [vmem:[#allocation9] sm:$0xff] %v1934_v9 }
0x1dad   :  { %v1936_v10 = vpop.f32.mrf.mxu0 }
0x1dae   :  { %2429 = shalt.err (!%p2426_p5)
}
0x1daf   :  { %1949 = dma.vmem_to_hbm [thread:$0]  %s1947_s16, 128, %s3037_s9, [#allocation5]   ;;  %v2119_v36 = vpop.f32.mrf.mxu0 }
0x1db0   :  { %2442 = dma.done.wait [#allocation5], 128  }
0x1db1   :  { %2443 = vsyncadd [#allocation5], 4294967168 }
0x1db2   :  { %1953 = vsyncpa [#allocation4], 1 }
0x1db3   :  { %1954 = vsyncpa [#allocation7], 1 }
0x1db4   :  { %1955 = vsyncpa [#allocation5], 1 }

</bundles_post_ra>
